<compile_context>
chip_gen: v7x
topology: tpu7x:2x2x1
jax: 0.10.0
libtpu: 0.0.40
codegen_flags: <defaults>
</compile_context>

<pallas_src>
import functools
import math

import jax
import jax.numpy as jnp
from jax.experimental import pallas as pl
from jax.experimental.pallas import tpu as pltpu


def _layernorm(x, gamma, beta, eps=1e-5):
    # x: (R, H), gamma/beta: (1, H).  Matches nn.LayerNorm (biased variance).
    mean = jnp.mean(x, axis=-1, keepdims=True)
    var = jnp.mean((x - mean) ** 2, axis=-1, keepdims=True)
    inv = jax.lax.rsqrt(var + eps)
    return (x - mean) * inv * gamma + beta


_SQRT_HALF = 0.7071067811865476


def _gelu_exact(x):
    # nn.GELU() default: exact erf-based gelu.
    return 0.5 * x * (1.0 + jax.lax.erf(x * _SQRT_HALF))


def _softmax_last(x, *, approx):
    m = jnp.max(x, axis=-1, keepdims=True)
    e = jnp.exp(x - m)
    denom = jnp.sum(e, axis=-1, keepdims=True)
    if approx:
        return e * pl.reciprocal(denom, approx=True)   # EUP slot instead of VALU divide
    return e / denom


def encoder_layer_kernel(
    xq_ref, xkv_ref, bias_ref,
    ln1_g_ref, ln1_b_ref,
    wq_ref, bq_ref, wkv_ref, bkv_ref, wo_ref, bo_ref,
    ln2_g_ref, ln2_b_ref,
    w1_ref, b1_ref, w2_ref, b2_ref,
    o_ref,
    kh_scr, vh_scr, x1_scr, y2_scr, acc_scr,
    *, num_heads, compute_dtype,
):
    qi = pl.program_id(1)
    fi = pl.program_id(2)
    exact = jnp.dtype(compute_dtype) == jnp.dtype(jnp.float32)

    # ---- K/V projection: computed ONCE per batch, cached across q-tiles ----
    @pl.when((qi == 0) & (fi == 0))
    def _fill_kv_cache():
        xkv = xkv_ref[0]                                    # (S, H) full sequence
        S, H = xkv.shape
        dk = H // num_heads
        ykv = _layernorm(xkv, ln1_g_ref[...], ln1_b_ref[...]).astype(compute_dtype)
        # Fused K/V projection: one (S, H) x (H, 2H) matmul, f32 accumulation.
        kv = jnp.dot(ykv, wkv_ref[...],
                     preferred_element_type=jnp.float32) + bkv_ref[...]   # (S, 2H)
        kv = kv.astype(compute_dtype)                       # cast BEFORE transposes
        kvt = jnp.swapaxes(kv.T.reshape(2, num_heads, dk, S), 2, 3)       # (2, NH, S, dk)
        kh_scr[...] = kvt[0]
        vh_scr[...] = kvt[1]

    # ---- attention + first residual: once per (batch, q-tile) --------------
    @pl.when(fi == 0)
    def _attention_block():
        xq = xq_ref[0]                                      # (tq, H) query rows / residual
        tq, H = xq.shape
        dk = H // num_heads

        yq = _layernorm(xq, ln1_g_ref[...], ln1_b_ref[...]).astype(compute_dtype)
        # Q projection (1/sqrt(dk) already folded into wq/bq in the wrapper).
        q = jnp.dot(yq, wq_ref[...],
                    preferred_element_type=jnp.float32) + bq_ref[...]     # (tq, H) f32
        q = q.astype(compute_dtype)                         # cast BEFORE transposes
        q_h = jnp.swapaxes(q.T.reshape(num_heads, dk, tq), 1, 2)          # (NH, tq, dk)

        # Batched attention over all heads: one MXU stream, no per-head loop.
        s = jnp.einsum("hqd,hkd->hqk", q_h, kh_scr[...],
                       preferred_element_type=jnp.float32)                # (NH, tq, S)
        s = s + bias_ref[0].astype(jnp.float32)             # bias streamed in compute dtype
        p = _softmax_last(s, approx=not exact)                            # f32
        ctx = jnp.einsum("hqk,hkd->hqd", p.astype(compute_dtype), vh_scr[...],
                         preferred_element_type=jnp.float32)              # (NH, tq, dk)
        ctx = ctx.astype(compute_dtype)                      # cast BEFORE merge transposes

        # Merge heads back to (tq, H) with head-major columns.
        attn = jnp.swapaxes(ctx, 1, 2).reshape(H, tq).T                   # (tq, H)
        attn = jnp.dot(attn, wo_ref[...],
                       preferred_element_type=jnp.float32) + bo_ref[...]
        x1 = xq + attn                                       # residual, f32

        x1_scr[...] = x1
        y2_scr[...] = _layernorm(x1, ln2_g_ref[...], ln2_b_ref[...]).astype(compute_dtype)
        acc_scr[...] = jnp.zeros_like(acc_scr)

    # ---- FFN: one tF-wide chunk of the inner dimension per grid step -------
    h1 = jnp.dot(y2_scr[...], w1_ref[...],
                 preferred_element_type=jnp.float32) + b1_ref[...]        # (tq, tF) f32
    h1 = _gelu_exact(h1).astype(compute_dtype)
    acc_scr[...] += jnp.dot(h1, w2_ref[...], preferred_element_type=jnp.float32)

    # ---- second residual + output: after the last FFN chunk ----------------
    @pl.when(fi == pl.num_programs(2) - 1)
    def _write_out():
        o_ref[0] = (x1_scr[...] + acc_scr[...] + b2_ref[...]).astype(o_ref.dtype)


def encoder_layer(x, attn_bias, params, num_heads, *,
                  compute_dtype=None, q_tile=None, f_tile=None,
                  vmem_limit_bytes=48 * 1024 * 1024):
    """Fused encoder layer.  compute_dtype=None -> bf16 on TPU, f32 otherwise."""
    if compute_dtype is None:
        compute_dtype = (jnp.bfloat16 if jax.default_backend() == "tpu"
                         else jnp.float32)
    cd = jnp.dtype(compute_dtype)

    B, S, H = x.shape
    F = params["w1"].shape[1]
    assert H % num_heads == 0
    dk = H // num_heads
    scale = dk ** (-0.5)

    # --- tiling knobs (re-derive per generation; see header) ---
    tq = q_tile if q_tile is not None else (128 if S % 128 == 0 else S)
    if f_tile is not None:
        tF = f_tile
    else:
        # FFN-weight residency: if w1+w2 (in compute dtype) fit a ~16 MiB VMEM
        # budget, keep them resident (FT=1, DMA'd once); otherwise stream
        # 512-wide tiles (re-fetched per (b, qi) -- the expensive case).
        if 2 * H * F * cd.itemsize <= 16 * 1024 * 1024:
            tF = F
        elif F % 512 == 0:
            tF = 512
        else:
            tF = F
    assert S % tq == 0 and F % tF == 0
    QT, FT = S // tq, F // tF

    # Fold the attention scale into the Q projection, fuse K/V weights into one
    # (H, 2H) matmul, cast matmul weights (and the bias stream) to compute dtype.
    wq = (params["wq"] * scale).astype(cd)
    bq = params["bq"] * scale
    wkv = jnp.concatenate([params["wk"], params["wv"]], axis=1).astype(cd)
    bkv = jnp.concatenate([params["bk"], params["bv"]], axis=1)
    wo = params["wo"].astype(cd)
    w1 = params["w1"].astype(cd)
    w2 = params["w2"].astype(cd)
    bias = attn_bias.astype(cd)    # bf16 stream on fast path; f32 on strict path

    def const2d(shape):
        return pl.BlockSpec(shape, lambda b, qi, fi: (0, 0))

    in_specs = [
        pl.BlockSpec((1, tq, H), lambda b, qi, fi: (b, qi, 0)),            # x (q rows)
        pl.BlockSpec((1, S, H), lambda b, qi, fi: (b, 0, 0)),              # x (full, K/V)
        pl.BlockSpec((1, num_heads, tq, S), lambda b, qi, fi: (b, 0, qi, 0)),  # attn bias
        const2d((1, H)), const2d((1, H)),                                  # ln1 gamma/beta
        const2d((H, H)), const2d((1, H)),                                  # wq(scaled), bq(scaled)
        const2d((H, 2 * H)), const2d((1, 2 * H)),                          # wkv, bkv
        const2d((H, H)), const2d((1, H)),                                  # wo, bo
        const2d((1, H)), const2d((1, H)),                                  # ln2 gamma/beta
        pl.BlockSpec((H, tF), lambda b, qi, fi: (0, fi)),                  # w1 tile
        pl.BlockSpec((1, tF), lambda b, qi, fi: (0, fi)),                  # b1 tile
        pl.BlockSpec((tF, H), lambda b, qi, fi: (fi, 0)),                  # w2 tile
        const2d((1, H)),                                                   # b2
    ]

    kernel = functools.partial(encoder_layer_kernel,
                               num_heads=num_heads, compute_dtype=cd)

    return pl.pallas_call(
        kernel,
        out_shape=jax.ShapeDtypeStruct((B, S, H), x.dtype),
        grid=(B, QT, FT),
        in_specs=in_specs,
        out_specs=pl.BlockSpec((1, tq, H), lambda b, qi, fi: (b, qi, 0)),
        scratch_shapes=[
            pltpu.VMEM((num_heads, S, dk), cd),   # K cache (head-split), per batch
            pltpu.VMEM((num_heads, S, dk), cd),   # V cache (head-split), per batch
            pltpu.VMEM((tq, H), jnp.float32),     # x1 (post-attention residual)
            pltpu.VMEM((tq, H), cd),              # ln2(x1), matmul-ready
            pltpu.VMEM((tq, H), jnp.float32),     # FFN f32 accumulator
        ],
        compiler_params=pltpu.CompilerParams(
            # qi MUST be "arbitrary": the K/V cache is filled at qi==0 and
            # reused by later q-tiles of the same batch on the same core.
            dimension_semantics=("parallel", "arbitrary", "arbitrary"),
            vmem_limit_bytes=vmem_limit_bytes,
        ),
    )(
        x, x, bias,
        params["ln1_g"], params["ln1_b"],
        wq, bq, wkv, bkv, wo, params["bo"],
        params["ln2_g"], params["ln2_b"],
        w1, params["b1"], w2, params["b2"],
    )


def reference_encoder_layer(x, attn_bias, params, num_heads):
    # Pure-JAX f32 reference for validation (matches the PyTorch module).
    B, S, H = x.shape
    dk = H // num_heads
    scale = dk ** (-0.5)

    def ln(v, g, b, eps=1e-5):
        m = jnp.mean(v, axis=-1, keepdims=True)
        var = jnp.mean((v - m) ** 2, axis=-1, keepdims=True)
        return (v - m) / jnp.sqrt(var + eps) * g + b

    y = ln(x, params["ln1_g"], params["ln1_b"])
    q = y @ params["wq"] + params["bq"]
    k = y @ params["wk"] + params["bk"]
    v = y @ params["wv"] + params["bv"]
    q = q.reshape(B, S, num_heads, dk).transpose(0, 2, 1, 3) * scale
    k = k.reshape(B, S, num_heads, dk).transpose(0, 2, 1, 3)
    v = v.reshape(B, S, num_heads, dk).transpose(0, 2, 1, 3)
    s = jnp.einsum("bhqd,bhkd->bhqk", q, k) + attn_bias
    p = jax.nn.softmax(s, axis=-1)
    a = jnp.einsum("bhqk,bhkd->bhqd", p, v).transpose(0, 2, 1, 3).reshape(B, S, H)
    a = a @ params["wo"] + params["bo"]
    x1 = x + a
    y2 = ln(x1, params["ln2_g"], params["ln2_b"])
    h1 = jax.nn.gelu(y2 @ params["w1"] + params["b1"], approximate=False)
    h2 = h1 @ params["w2"] + params["b2"]
    return x1 + h2


def init_params(key, hidden, ffn):
    keys = jax.random.split(key, 6)

    def lin(k, fan_in, fan_out):
        bound = 1.0 / math.sqrt(fan_in)
        kw, kb = jax.random.split(k)
        w = jax.random.uniform(kw, (fan_in, fan_out), jnp.float32, -bound, bound)
        b = jax.random.uniform(kb, (1, fan_out), jnp.float32, -bound, bound)
        return w, b

    wq, bq = lin(keys[0], hidden, hidden)
    wk, bk = lin(keys[1], hidden, hidden)
    wv, bv = lin(keys[2], hidden, hidden)
    wo, bo = lin(keys[3], hidden, hidden)
    w1, b1 = lin(keys[4], hidden, ffn)
    w2, b2 = lin(keys[5], ffn, hidden)
    return dict(
        ln1_g=jnp.ones((1, hidden), jnp.float32),
        ln1_b=jnp.zeros((1, hidden), jnp.float32),
        ln2_g=jnp.ones((1, hidden), jnp.float32),
        ln2_b=jnp.zeros((1, hidden), jnp.float32),
        wq=wq, bq=bq, wk=wk, bk=bk, wv=wv, bv=bv, wo=wo, bo=bo,
        w1=w1, b1=b1, w2=w2, b2=b2,
    )


if __name__ == "__main__":
    B, S, H, FFN, NH = 2, 16, 32, 256, 4

    key = jax.random.PRNGKey(0)
    kx, kb, kp = jax.random.split(key, 3)
    x = jax.random.normal(kx, (B, S, H), jnp.float32)
    attn_bias = 0.1 * jax.random.normal(kb, (B, NH, S, S), jnp.float32)
    params = init_params(kp, H, FFN)

    ref = reference_encoder_layer(x, attn_bias, params, NH)

    # 1) Strict f32 path, single tile (exact semantics check).
    out = jax.block_until_ready(
        encoder_layer(x, attn_bias, params, NH, compute_dtype=jnp.float32))
    assert out.shape == (B, S, H)
    assert jnp.allclose(out, ref, atol=1e-4, rtol=1e-4), \
        float(jnp.max(jnp.abs(out - ref)))

    # 2) Strict f32 path exercising q-tiling (K/V cache reuse across q-tiles)
    #    and FFN inner-dim streaming (QT=2, FT=2).
    out = jax.block_until_ready(
        encoder_layer(x, attn_bias, params, NH,
                      compute_dtype=jnp.float32, q_tile=8, f_tile=128))
    assert jnp.allclose(out, ref, atol=1e-4, rtol=1e-4), \
        float(jnp.max(jnp.abs(out - ref)))

    # 3) bf16 MXU fast path (f32 accumulation, bf16 bias stream, approx softmax
    #    reciprocal).  Only run on a real TPU backend: CPU / interpret-mode XLA
    #    has no BF16 x BF16 -> F32 dot kernel.
    if jax.default_backend() == "tpu":
        out = jax.block_until_ready(
            encoder_layer(x, attn_bias, params, NH,
                          compute_dtype=jnp.bfloat16, q_tile=8, f_tile=128))
        assert jnp.allclose(out, ref, atol=5e-2, rtol=5e-2), \
            float(jnp.max(jnp.abs(out - ref)))

    print("KERNEL_OK")
</pallas_src>

<mosaic_0001>
module attributes {stable_mosaic.version = 11 : i64} {
  func.func @encoder_layer_kernel(%arg0: i32, %arg1: i32, %arg2: i32, %arg3: memref<1x16x32xf32, #tpu.memory_space<vmem>>, %arg4: memref<1x16x32xf32, #tpu.memory_space<vmem>>, %arg5: memref<1x4x16x16xf32, #tpu.memory_space<vmem>>, %arg6: memref<1x32xf32, #tpu.memory_space<vmem>>, %arg7: memref<1x32xf32, #tpu.memory_space<vmem>>, %arg8: memref<32x32xf32, #tpu.memory_space<vmem>>, %arg9: memref<1x32xf32, #tpu.memory_space<vmem>>, %arg10: memref<32x64xf32, #tpu.memory_space<vmem>>, %arg11: memref<1x64xf32, #tpu.memory_space<vmem>>, %arg12: memref<32x32xf32, #tpu.memory_space<vmem>>, %arg13: memref<1x32xf32, #tpu.memory_space<vmem>>, %arg14: memref<1x32xf32, #tpu.memory_space<vmem>>, %arg15: memref<1x32xf32, #tpu.memory_space<vmem>>, %arg16: memref<32x256xf32, #tpu.memory_space<vmem>>, %arg17: memref<1x256xf32, #tpu.memory_space<vmem>>, %arg18: memref<256x32xf32, #tpu.memory_space<vmem>>, %arg19: memref<1x32xf32, #tpu.memory_space<vmem>>, %arg20: memref<1x16x32xf32, #tpu.memory_space<vmem>>, %arg21: memref<4x16x8xf32, #tpu.memory_space<vmem>>, %arg22: memref<4x16x8xf32, #tpu.memory_space<vmem>>, %arg23: memref<16x32xf32, #tpu.memory_space<vmem>>, %arg24: memref<16x32xf32, #tpu.memory_space<vmem>>, %arg25: memref<16x32xf32, #tpu.memory_space<vmem>>) attributes {dimension_semantics = [#tpu.dimension_semantics<parallel>, #tpu.dimension_semantics<arbitrary>, #tpu.dimension_semantics<arbitrary>], iteration_bounds = array<i64: 2, 1, 1>, scalar_prefetch = 0 : i64, scratch_operands = 5 : i64, tpu.core_type = #tpu.core_type<tc>, window_params = [{transform_indices = @transform_0, window_bounds = array<i64: 1, 16, 32>}, {transform_indices = @transform_1, window_bounds = array<i64: 1, 16, 32>}, {transform_indices = @transform_2, window_bounds = array<i64: 1, 4, 16, 16>}, {pipeline_mode = #tpu.pipeline_mode<synchronous>, transform_indices = @transform_3, window_bounds = array<i64: 1, 32>}, {pipeline_mode = #tpu.pipeline_mode<synchronous>, transform_indices = @transform_4, window_bounds = array<i64: 1, 32>}, {pipeline_mode = #tpu.pipeline_mode<synchronous>, transform_indices = @transform_5, window_bounds = array<i64: 32, 32>}, {pipeline_mode = #tpu.pipeline_mode<synchronous>, transform_indices = @transform_6, window_bounds = array<i64: 1, 32>}, {pipeline_mode = #tpu.pipeline_mode<synchronous>, transform_indices = @transform_7, window_bounds = array<i64: 32, 64>}, {pipeline_mode = #tpu.pipeline_mode<synchronous>, transform_indices = @transform_8, window_bounds = array<i64: 1, 64>}, {pipeline_mode = #tpu.pipeline_mode<synchronous>, transform_indices = @transform_9, window_bounds = array<i64: 32, 32>}, {pipeline_mode = #tpu.pipeline_mode<synchronous>, transform_indices = @transform_10, window_bounds = array<i64: 1, 32>}, {pipeline_mode = #tpu.pipeline_mode<synchronous>, transform_indices = @transform_11, window_bounds = array<i64: 1, 32>}, {pipeline_mode = #tpu.pipeline_mode<synchronous>, transform_indices = @transform_12, window_bounds = array<i64: 1, 32>}, {transform_indices = @transform_13, window_bounds = array<i64: 32, 256>}, {transform_indices = @transform_14, window_bounds = array<i64: 1, 256>}, {transform_indices = @transform_15, window_bounds = array<i64: 256, 32>}, {pipeline_mode = #tpu.pipeline_mode<synchronous>, transform_indices = @transform_16, window_bounds = array<i64: 1, 32>}, {transform_indices = @transform_17, window_bounds = array<i64: 1, 16, 32>}]} {
    %c0_i32 = arith.constant 0 : i32
    %0 = arith.cmpi eq, %arg1, %c0_i32 : i32
    %c0_i32_0 = arith.constant 0 : i32
    %1 = arith.cmpi eq, %arg2, %c0_i32_0 : i32
    %2 = arith.andi %0, %1 : i1
    %3 = arith.extui %2 : i1 to i32
    %c0_i32_1 = arith.constant 0 : i32
    %4 = arith.cmpi ne, %3, %c0_i32_1 : i32
    scf.if %4 {
      %c0_21 = arith.constant 0 : index
      %c0_22 = arith.constant 0 : index
      %c0_23 = arith.constant 0 : index
      %30 = vector.load %arg4[%c0_21, %c0_22, %c0_23] : memref<1x16x32xf32, #tpu.memory_space<vmem>>, vector<1x16x32xf32>
      %31 = vector.shape_cast %30 : vector<1x16x32xf32> to vector<16x32xf32>
      %c0_24 = arith.constant 0 : index
      %c0_25 = arith.constant 0 : index
      %32 = vector.load %arg6[%c0_24, %c0_25] : memref<1x32xf32, #tpu.memory_space<vmem>>, vector<1x32xf32>
      %c0_26 = arith.constant 0 : index
      %c0_27 = arith.constant 0 : index
      %33 = vector.load %arg7[%c0_26, %c0_27] : memref<1x32xf32, #tpu.memory_space<vmem>>, vector<1x32xf32>
      %cst_28 = arith.constant dense<0.000000e+00> : vector<16xf32>
      %34 = vector.multi_reduction <add>, %31, %cst_28 [1] : vector<16x32xf32> to vector<16xf32>
      %35 = vector.shape_cast %34 : vector<16xf32> to vector<16x1xf32>
      %cst_29 = arith.constant 3.200000e+01 : f32
      %36 = vector.broadcast %cst_29 : f32 to vector<16x1xf32>
      %37 = arith.divf %35, %36 : vector<16x1xf32>
      %38 = vector.broadcast %37 : vector<16x1xf32> to vector<16x32xf32>
      %39 = arith.subf %31, %38 : vector<16x32xf32>
      %40 = arith.mulf %39, %39 : vector<16x32xf32>
      %cst_30 = arith.constant dense<0.000000e+00> : vector<16xf32>
      %41 = vector.multi_reduction <add>, %40, %cst_30 [1] : vector<16x32xf32> to vector<16xf32>
      %42 = vector.shape_cast %41 : vector<16xf32> to vector<16x1xf32>
      %cst_31 = arith.constant 3.200000e+01 : f32
      %43 = vector.broadcast %cst_31 : f32 to vector<16x1xf32>
      %44 = arith.divf %42, %43 : vector<16x1xf32>
      %cst_32 = arith.constant 9.99999974E-6 : f32
      %45 = vector.broadcast %cst_32 : f32 to vector<16x1xf32>
      %46 = arith.addf %44, %45 : vector<16x1xf32>
      %47 = math.rsqrt %46 : vector<16x1xf32>
      %48 = vector.broadcast %37 : vector<16x1xf32> to vector<16x32xf32>
      %49 = arith.subf %31, %48 : vector<16x32xf32>
      %50 = vector.broadcast %47 : vector<16x1xf32> to vector<16x32xf32>
      %51 = arith.mulf %49, %50 : vector<16x32xf32>
      %52 = vector.broadcast %32 : vector<1x32xf32> to vector<16x32xf32>
      %53 = arith.mulf %51, %52 : vector<16x32xf32>
      %54 = vector.broadcast %33 : vector<1x32xf32> to vector<16x32xf32>
      %55 = arith.addf %53, %54 : vector<16x32xf32>
      %c0_33 = arith.constant 0 : index
      %c0_34 = arith.constant 0 : index
      %56 = vector.load %arg10[%c0_33, %c0_34] : memref<32x64xf32, #tpu.memory_space<vmem>>, vector<32x64xf32>
      %cst_35 = arith.constant dense<0.000000e+00> : vector<16x64xf32>
      %57 = tpu.matmul %55, %56, %cst_35 {dimension_numbers = #tpu.dot_dimension_numbers<[1], [0], [0], [1], [0, 0, 1, 1], [], []>} : vector<16x32xf32>, vector<32x64xf32>, vector<16x64xf32> -> vector<16x64xf32>
      %c0_36 = arith.constant 0 : index
      %c0_37 = arith.constant 0 : index
      %58 = vector.load %arg11[%c0_36, %c0_37] : memref<1x64xf32, #tpu.memory_space<vmem>>, vector<1x64xf32>
      %59 = vector.broadcast %58 : vector<1x64xf32> to vector<16x64xf32>
      %60 = arith.addf %57, %59 : vector<16x64xf32>
      %61 = tpu.transpose %60, [1, 0] : vector<16x64xf32> -> vector<64x16xf32>
      %62 = vector.shape_cast %61 : vector<64x16xf32> to vector<2x4x8x16xf32>
      %63 = tpu.transpose %62, [0, 1, 3, 2] : vector<2x4x8x16xf32> -> vector<2x4x16x8xf32>
      %64 = vector.extract_strided_slice %63 {offsets = [0, 0, 0, 0], sizes = [1, 4, 16, 8], strides = [1, 1, 1, 1]} : vector<2x4x16x8xf32> to vector<1x4x16x8xf32>
      %65 = vector.shape_cast %64 : vector<1x4x16x8xf32> to vector<4x16x8xf32>
      %c0_38 = arith.constant 0 : index
      %c0_39 = arith.constant 0 : index
      %c0_40 = arith.constant 0 : index
      %66 = vector.load %arg21[%c0_38, %c0_39, %c0_40] : memref<4x16x8xf32, #tpu.memory_space<vmem>>, vector<4x16x8xf32>
      tpu.vector_store %arg21[%c0_38, %c0_39, %c0_40], %65 {strides = array<i32>} : memref<4x16x8xf32, #tpu.memory_space<vmem>>, vector<4x16x8xf32>,
      %67 = vector.extract_strided_slice %63 {offsets = [1, 0, 0, 0], sizes = [1, 4, 16, 8], strides = [1, 1, 1, 1]} : vector<2x4x16x8xf32> to vector<1x4x16x8xf32>
      %68 = vector.shape_cast %67 : vector<1x4x16x8xf32> to vector<4x16x8xf32>
      %c0_41 = arith.constant 0 : index
      %c0_42 = arith.constant 0 : index
      %c0_43 = arith.constant 0 : index
      %69 = vector.load %arg22[%c0_41, %c0_42, %c0_43] : memref<4x16x8xf32, #tpu.memory_space<vmem>>, vector<4x16x8xf32>
      tpu.vector_store %arg22[%c0_41, %c0_42, %c0_43], %68 {strides = array<i32>} : memref<4x16x8xf32, #tpu.memory_space<vmem>>, vector<4x16x8xf32>,
    } else {
    }
    %c0_i32_2 = arith.constant 0 : i32
    %5 = arith.cmpi eq, %arg2, %c0_i32_2 : i32
    %6 = arith.extui %5 : i1 to i32
    %c0_i32_3 = arith.constant 0 : i32
    %7 = arith.cmpi ne, %6, %c0_i32_3 : i32
    scf.if %7 {
      %c0_21 = arith.constant 0 : index
      %c0_22 = arith.constant 0 : index
      %c0_23 = arith.constant 0 : index
      %30 = vector.load %arg3[%c0_21, %c0_22, %c0_23] : memref<1x16x32xf32, #tpu.memory_space<vmem>>, vector<1x16x32xf32>
      %31 = vector.shape_cast %30 : vector<1x16x32xf32> to vector<16x32xf32>
      %c0_24 = arith.constant 0 : index
      %c0_25 = arith.constant 0 : index
      %32 = vector.load %arg6[%c0_24, %c0_25] : memref<1x32xf32, #tpu.memory_space<vmem>>, vector<1x32xf32>
      %c0_26 = arith.constant 0 : index
      %c0_27 = arith.constant 0 : index
      %33 = vector.load %arg7[%c0_26, %c0_27] : memref<1x32xf32, #tpu.memory_space<vmem>>, vector<1x32xf32>
      %cst_28 = arith.constant dense<0.000000e+00> : vector<16xf32>
      %34 = vector.multi_reduction <add>, %31, %cst_28 [1] : vector<16x32xf32> to vector<16xf32>
      %35 = vector.shape_cast %34 : vector<16xf32> to vector<16x1xf32>
      %cst_29 = arith.constant 3.200000e+01 : f32
      %36 = vector.broadcast %cst_29 : f32 to vector<16x1xf32>
      %37 = arith.divf %35, %36 : vector<16x1xf32>
      %38 = vector.broadcast %37 : vector<16x1xf32> to vector<16x32xf32>
      %39 = arith.subf %31, %38 : vector<16x32xf32>
      %40 = arith.mulf %39, %39 : vector<16x32xf32>
      %cst_30 = arith.constant dense<0.000000e+00> : vector<16xf32>
      %41 = vector.multi_reduction <add>, %40, %cst_30 [1] : vector<16x32xf32> to vector<16xf32>
      %42 = vector.shape_cast %41 : vector<16xf32> to vector<16x1xf32>
      %cst_31 = arith.constant 3.200000e+01 : f32
      %43 = vector.broadcast %cst_31 : f32 to vector<16x1xf32>
      %44 = arith.divf %42, %43 : vector<16x1xf32>
      %cst_32 = arith.constant 9.99999974E-6 : f32
      %45 = vector.broadcast %cst_32 : f32 to vector<16x1xf32>
      %46 = arith.addf %44, %45 : vector<16x1xf32>
      %47 = math.rsqrt %46 : vector<16x1xf32>
      %48 = vector.broadcast %37 : vector<16x1xf32> to vector<16x32xf32>
      %49 = arith.subf %31, %48 : vector<16x32xf32>
      %50 = vector.broadcast %47 : vector<16x1xf32> to vector<16x32xf32>
      %51 = arith.mulf %49, %50 : vector<16x32xf32>
      %52 = vector.broadcast %32 : vector<1x32xf32> to vector<16x32xf32>
      %53 = arith.mulf %51, %52 : vector<16x32xf32>
      %54 = vector.broadcast %33 : vector<1x32xf32> to vector<16x32xf32>
      %55 = arith.addf %53, %54 : vector<16x32xf32>
      %c0_33 = arith.constant 0 : index
      %c0_34 = arith.constant 0 : index
      %56 = vector.load %arg8[%c0_33, %c0_34] : memref<32x32xf32, #tpu.memory_space<vmem>>, vector<32x32xf32>
      %cst_35 = arith.constant dense<0.000000e+00> : vector<16x32xf32>
      %57 = tpu.matmul %55, %56, %cst_35 {dimension_numbers = #tpu.dot_dimension_numbers<[1], [0], [0], [1], [0, 0, 1, 1], [], []>} : vector<16x32xf32>, vector<32x32xf32>, vector<16x32xf32> -> vector<16x32xf32>
      %c0_36 = arith.constant 0 : index
      %c0_37 = arith.constant 0 : index
      %58 = vector.load %arg9[%c0_36, %c0_37] : memref<1x32xf32, #tpu.memory_space<vmem>>, vector<1x32xf32>
      %59 = vector.broadcast %58 : vector<1x32xf32> to vector<16x32xf32>
      %60 = arith.addf %57, %59 : vector<16x32xf32>
      %61 = tpu.transpose %60, [1, 0] : vector<16x32xf32> -> vector<32x16xf32>
      %62 = vector.shape_cast %61 : vector<32x16xf32> to vector<4x8x16xf32>
      %63 = tpu.transpose %62, [0, 2, 1] : vector<4x8x16xf32> -> vector<4x16x8xf32>
      %c0_38 = arith.constant 0 : index
      %c0_39 = arith.constant 0 : index
      %c0_40 = arith.constant 0 : index
      %64 = vector.load %arg21[%c0_38, %c0_39, %c0_40] : memref<4x16x8xf32, #tpu.memory_space<vmem>>, vector<4x16x8xf32>
      "tpu.trace_start"() <{level = 10 : i32, message = "hqd,hkd->hqk"}> : () -> ()
      %cst_41 = arith.constant dense<0.000000e+00> : vector<4x16x16xf32>
      %65 = tpu.matmul %63, %64, %cst_41 {dimension_numbers = #tpu.dot_dimension_numbers<[2], [2], [1], [1], [0, 0, 0, 1, 1, 1], [0], [0]>} : vector<4x16x8xf32>, vector<4x16x8xf32>, vector<4x16x16xf32> -> vector<4x16x16xf32>
      "tpu.trace_stop"() : () -> ()
      %c0_42 = arith.constant 0 : index
      %c0_43 = arith.constant 0 : index
      %c0_44 = arith.constant 0 : index
      %c0_45 = arith.constant 0 : index
      %66 = vector.load %arg5[%c0_42, %c0_43, %c0_44, %c0_45] : memref<1x4x16x16xf32, #tpu.memory_space<vmem>>, vector<1x4x16x16xf32>
      %67 = vector.shape_cast %66 : vector<1x4x16x16xf32> to vector<4x16x16xf32>
      %68 = arith.addf %65, %67 : vector<4x16x16xf32>
      %cst_46 = arith.constant dense<0xFF800000> : vector<4x16xf32>
      %69 = vector.multi_reduction <maximumf>, %68, %cst_46 [2] : vector<4x16x16xf32> to vector<4x16xf32>
      %70 = vector.shape_cast %69 : vector<4x16xf32> to vector<4x16x1xf32>
      %71 = vector.broadcast %70 : vector<4x16x1xf32> to vector<4x16x16xf32>
      %72 = arith.subf %68, %71 : vector<4x16x16xf32>
      %73 = math.exp %72 : vector<4x16x16xf32>
      %cst_47 = arith.constant dense<0.000000e+00> : vector<4x16xf32>
      %74 = vector.multi_reduction <add>, %73, %cst_47 [2] : vector<4x16x16xf32> to vector<4x16xf32>
      %75 = vector.shape_cast %74 : vector<4x16xf32> to vector<4x16x1xf32>
      %76 = vector.broadcast %75 : vector<4x16x1xf32> to vector<4x16x16xf32>
      %77 = arith.divf %73, %76 : vector<4x16x16xf32>
      %c0_48 = arith.constant 0 : index
      %c0_49 = arith.constant 0 : index
      %c0_50 = arith.constant 0 : index
      %78 = vector.load %arg22[%c0_48, %c0_49, %c0_50] : memref<4x16x8xf32, #tpu.memory_space<vmem>>, vector<4x16x8xf32>
      "tpu.trace_start"() <{level = 10 : i32, message = "hqk,hkd->hqd"}> : () -> ()
      %cst_51 = arith.constant dense<0.000000e+00> : vector<4x16x8xf32>
      %79 = tpu.matmul %77, %78, %cst_51 {dimension_numbers = #tpu.dot_dimension_numbers<[2], [1], [1], [2], [0, 0, 0, 1, 1, 2], [0], [0]>} : vector<4x16x16xf32>, vector<4x16x8xf32>, vector<4x16x8xf32> -> vector<4x16x8xf32>
      "tpu.trace_stop"() : () -> ()
      %80 = tpu.transpose %79, [0, 2, 1] : vector<4x16x8xf32> -> vector<4x8x16xf32>
      %81 = vector.shape_cast %80 : vector<4x8x16xf32> to vector<32x16xf32>
      %82 = tpu.transpose %81, [1, 0] : vector<32x16xf32> -> vector<16x32xf32>
      %c0_52 = arith.constant 0 : index
      %c0_53 = arith.constant 0 : index
      %83 = vector.load %arg12[%c0_52, %c0_53] : memref<32x32xf32, #tpu.memory_space<vmem>>, vector<32x32xf32>
      %cst_54 = arith.constant dense<0.000000e+00> : vector<16x32xf32>
      %84 = tpu.matmul %82, %83, %cst_54 {dimension_numbers = #tpu.dot_dimension_numbers<[1], [0], [0], [1], [0, 0, 1, 1], [], []>} : vector<16x32xf32>, vector<32x32xf32>, vector<16x32xf32> -> vector<16x32xf32>
      %c0_55 = arith.constant 0 : index
      %c0_56 = arith.constant 0 : index
      %85 = vector.load %arg13[%c0_55, %c0_56] : memref<1x32xf32, #tpu.memory_space<vmem>>, vector<1x32xf32>
      %86 = vector.broadcast %85 : vector<1x32xf32> to vector<16x32xf32>
      %87 = arith.addf %84, %86 : vector<16x32xf32>
      %88 = arith.addf %31, %87 : vector<16x32xf32>
      %c0_57 = arith.constant 0 : index
      %c0_58 = arith.constant 0 : index
      %89 = vector.load %arg23[%c0_57, %c0_58] : memref<16x32xf32, #tpu.memory_space<vmem>>, vector<16x32xf32>
      tpu.vector_store %arg23[%c0_57, %c0_58], %88 {strides = array<i32>} : memref<16x32xf32, #tpu.memory_space<vmem>>, vector<16x32xf32>,
      %c0_59 = arith.constant 0 : index
      %c0_60 = arith.constant 0 : index
      %90 = vector.load %arg14[%c0_59, %c0_60] : memref<1x32xf32, #tpu.memory_space<vmem>>, vector<1x32xf32>
      %c0_61 = arith.constant 0 : index
      %c0_62 = arith.constant 0 : index
      %91 = vector.load %arg15[%c0_61, %c0_62] : memref<1x32xf32, #tpu.memory_space<vmem>>, vector<1x32xf32>
      %cst_63 = arith.constant dense<0.000000e+00> : vector<16xf32>
      %92 = vector.multi_reduction <add>, %88, %cst_63 [1] : vector<16x32xf32> to vector<16xf32>
      %93 = vector.shape_cast %92 : vector<16xf32> to vector<16x1xf32>
      %cst_64 = arith.constant 3.200000e+01 : f32
      %94 = vector.broadcast %cst_64 : f32 to vector<16x1xf32>
      %95 = arith.divf %93, %94 : vector<16x1xf32>
      %96 = vector.broadcast %95 : vector<16x1xf32> to vector<16x32xf32>
      %97 = arith.subf %88, %96 : vector<16x32xf32>
      %98 = arith.mulf %97, %97 : vector<16x32xf32>
      %cst_65 = arith.constant dense<0.000000e+00> : vector<16xf32>
      %99 = vector.multi_reduction <add>, %98, %cst_65 [1] : vector<16x32xf32> to vector<16xf32>
      %100 = vector.shape_cast %99 : vector<16xf32> to vector<16x1xf32>
      %cst_66 = arith.constant 3.200000e+01 : f32
      %101 = vector.broadcast %cst_66 : f32 to vector<16x1xf32>
      %102 = arith.divf %100, %101 : vector<16x1xf32>
      %cst_67 = arith.constant 9.99999974E-6 : f32
      %103 = vector.broadcast %cst_67 : f32 to vector<16x1xf32>
      %104 = arith.addf %102, %103 : vector<16x1xf32>
      %105 = math.rsqrt %104 : vector<16x1xf32>
      %106 = vector.broadcast %95 : vector<16x1xf32> to vector<16x32xf32>
      %107 = arith.subf %88, %106 : vector<16x32xf32>
      %108 = vector.broadcast %105 : vector<16x1xf32> to vector<16x32xf32>
      %109 = arith.mulf %107, %108 : vector<16x32xf32>
      %110 = vector.broadcast %90 : vector<1x32xf32> to vector<16x32xf32>
      %111 = arith.mulf %109, %110 : vector<16x32xf32>
      %112 = vector.broadcast %91 : vector<1x32xf32> to vector<16x32xf32>
      %113 = arith.addf %111, %112 : vector<16x32xf32>
      %c0_68 = arith.constant 0 : index
      %c0_69 = arith.constant 0 : index
      %114 = vector.load %arg24[%c0_68, %c0_69] : memref<16x32xf32, #tpu.memory_space<vmem>>, vector<16x32xf32>
      tpu.vector_store %arg24[%c0_68, %c0_69], %113 {strides = array<i32>} : memref<16x32xf32, #tpu.memory_space<vmem>>, vector<16x32xf32>,
      %cst_70 = arith.constant 0.000000e+00 : f32
      %115 = vector.broadcast %cst_70 : f32 to vector<16x32xf32>
      %c0_71 = arith.constant 0 : index
      %c0_72 = arith.constant 0 : index
      %116 = vector.load %arg25[%c0_71, %c0_72] : memref<16x32xf32, #tpu.memory_space<vmem>>, vector<16x32xf32>
      tpu.vector_store %arg25[%c0_71, %c0_72], %115 {strides = array<i32>} : memref<16x32xf32, #tpu.memory_space<vmem>>, vector<16x32xf32>,
    } else {
    }
    %c0 = arith.constant 0 : index
    %c0_4 = arith.constant 0 : index
    %8 = vector.load %arg24[%c0, %c0_4] : memref<16x32xf32, #tpu.memory_space<vmem>>, vector<16x32xf32>
    %c0_5 = arith.constant 0 : index
    %c0_6 = arith.constant 0 : index
    %9 = vector.load %arg16[%c0_5, %c0_6] : memref<32x256xf32, #tpu.memory_space<vmem>>, vector<32x256xf32>
    %cst = arith.constant dense<0.000000e+00> : vector<16x256xf32>
    %10 = tpu.matmul %8, %9, %cst {dimension_numbers = #tpu.dot_dimension_numbers<[1], [0], [0], [1], [0, 0, 1, 1], [], []>} : vector<16x32xf32>, vector<32x256xf32>, vector<16x256xf32> -> vector<16x256xf32>
    %c0_7 = arith.constant 0 : index
    %c0_8 = arith.constant 0 : index
    %11 = vector.load %arg17[%c0_7, %c0_8] : memref<1x256xf32, #tpu.memory_space<vmem>>, vector<1x256xf32>
    %12 = vector.broadcast %11 : vector<1x256xf32> to vector<16x256xf32>
    %13 = arith.addf %10, %12 : vector<16x256xf32>
    %cst_9 = arith.constant 5.000000e-01 : f32
    %14 = vector.broadcast %cst_9 : f32 to vector<16x256xf32>
    %15 = arith.mulf %14, %13 : vector<16x256xf32>
    %cst_10 = arith.constant 0.707106769 : f32
    %16 = vector.broadcast %cst_10 : f32 to vector<16x256xf32>
    %17 = arith.mulf %13, %16 : vector<16x256xf32>
    %18 = math.erf %17 : vector<16x256xf32>
    %cst_11 = arith.constant 1.000000e+00 : f32
    %19 = vector.broadcast %cst_11 : f32 to vector<16x256xf32>
    %20 = arith.addf %19, %18 : vector<16x256xf32>
    %21 = arith.mulf %15, %20 : vector<16x256xf32>
    %c0_12 = arith.constant 0 : index
    %c0_13 = arith.constant 0 : index
    %22 = vector.load %arg25[%c0_12, %c0_13] : memref<16x32xf32, #tpu.memory_space<vmem>>, vector<16x32xf32>
    %c0_14 = arith.constant 0 : index
    %c0_15 = arith.constant 0 : index
    %23 = vector.load %arg18[%c0_14, %c0_15] : memref<256x32xf32, #tpu.memory_space<vmem>>, vector<256x32xf32>
    %cst_16 = arith.constant dense<0.000000e+00> : vector<16x32xf32>
    %24 = tpu.matmul %21, %23, %cst_16 {dimension_numbers = #tpu.dot_dimension_numbers<[1], [0], [0], [1], [0, 0, 1, 1], [], []>} : vector<16x256xf32>, vector<256x32xf32>, vector<16x32xf32> -> vector<16x32xf32>
    %25 = arith.addf %22, %24 : vector<16x32xf32>
    %c0_17 = arith.constant 0 : index
    %c0_18 = arith.constant 0 : index
    %26 = vector.load %arg25[%c0_17, %c0_18] : memref<16x32xf32, #tpu.memory_space<vmem>>, vector<16x32xf32>
    tpu.vector_store %arg25[%c0_17, %c0_18], %25 {strides = array<i32>} : memref<16x32xf32, #tpu.memory_space<vmem>>, vector<16x32xf32>,
    %c0_i32_19 = arith.constant 0 : i32
    %27 = arith.cmpi eq, %arg2, %c0_i32_19 : i32
    %28 = arith.extui %27 : i1 to i32
    %c0_i32_20 = arith.constant 0 : i32
    %29 = arith.cmpi ne, %28, %c0_i32_20 : i32
    scf.if %29 {
      %c0_21 = arith.constant 0 : index
      %c0_22 = arith.constant 0 : index
      %30 = vector.load %arg23[%c0_21, %c0_22] : memref<16x32xf32, #tpu.memory_space<vmem>>, vector<16x32xf32>
      %c0_23 = arith.constant 0 : index
      %c0_24 = arith.constant 0 : index
      %31 = vector.load %arg25[%c0_23, %c0_24] : memref<16x32xf32, #tpu.memory_space<vmem>>, vector<16x32xf32>
      %32 = arith.addf %30, %31 : vector<16x32xf32>
      %c0_25 = arith.constant 0 : index
      %c0_26 = arith.constant 0 : index
      %33 = vector.load %arg19[%c0_25, %c0_26] : memref<1x32xf32, #tpu.memory_space<vmem>>, vector<1x32xf32>
      %34 = vector.broadcast %33 : vector<1x32xf32> to vector<16x32xf32>
      %35 = arith.addf %32, %34 : vector<16x32xf32>
      %c0_27 = arith.constant 0 : index
      %c0_28 = arith.constant 0 : index
      %c0_29 = arith.constant 0 : index
      %36 = vector.load %arg20[%c0_27, %c0_28, %c0_29] : memref<1x16x32xf32, #tpu.memory_space<vmem>>, vector<1x16x32xf32>
      %37 = vector.shape_cast %36 : vector<1x16x32xf32> to vector<16x32xf32>
      %38 = vector.shape_cast %35 : vector<16x32xf32> to vector<1x16x32xf32>
      tpu.vector_store %arg20[%c0_27, %c0_28, %c0_29], %38 {strides = array<i32>} : memref<1x16x32xf32, #tpu.memory_space<vmem>>, vector<1x16x32xf32>,
    } else {
    }
    return
  }
  func.func @transform_0(%arg0: i32, %arg1: i32, %arg2: i32) -> (i32, i32, i32) {
    %c0_i32 = arith.constant 0 : i32
    %c0_i32_0 = arith.constant 0 : i32
    return %arg0, %arg1, %c0_i32 : i32, i32, i32
  }
  func.func @transform_1(%arg0: i32, %arg1: i32, %arg2: i32) -> (i32, i32, i32) {
    %c0_i32 = arith.constant 0 : i32
    %c0_i32_0 = arith.constant 0 : i32
    %c0_i32_1 = arith.constant 0 : i32
    return %arg0, %c0_i32, %c0_i32_0 : i32, i32, i32
  }
  func.func @transform_2(%arg0: i32, %arg1: i32, %arg2: i32) -> (i32, i32, i32, i32) {
    %c0_i32 = arith.constant 0 : i32
    %c0_i32_0 = arith.constant 0 : i32
    %c0_i32_1 = arith.constant 0 : i32
    return %arg0, %c0_i32, %arg1, %c0_i32_0 : i32, i32, i32, i32
  }
  func.func @transform_3(%arg0: i32, %arg1: i32, %arg2: i32) -> (i32, i32) {
    %c0_i32 = arith.constant 0 : i32
    %c0_i32_0 = arith.constant 0 : i32
    %c0_i32_1 = arith.constant 0 : i32
    return %c0_i32, %c0_i32_0 : i32, i32
  }
  func.func @transform_4(%arg0: i32, %arg1: i32, %arg2: i32) -> (i32, i32) {
    %c0_i32 = arith.constant 0 : i32
    %c0_i32_0 = arith.constant 0 : i32
    %c0_i32_1 = arith.constant 0 : i32
    return %c0_i32, %c0_i32_0 : i32, i32
  }
  func.func @transform_5(%arg0: i32, %arg1: i32, %arg2: i32) -> (i32, i32) {
    %c0_i32 = arith.constant 0 : i32
    %c0_i32_0 = arith.constant 0 : i32
    %c0_i32_1 = arith.constant 0 : i32
    return %c0_i32, %c0_i32_0 : i32, i32
  }
  func.func @transform_6(%arg0: i32, %arg1: i32, %arg2: i32) -> (i32, i32) {
    %c0_i32 = arith.constant 0 : i32
    %c0_i32_0 = arith.constant 0 : i32
    %c0_i32_1 = arith.constant 0 : i32
    return %c0_i32, %c0_i32_0 : i32, i32
  }
  func.func @transform_7(%arg0: i32, %arg1: i32, %arg2: i32) -> (i32, i32) {
    %c0_i32 = arith.constant 0 : i32
    %c0_i32_0 = arith.constant 0 : i32
    %c0_i32_1 = arith.constant 0 : i32
    return %c0_i32, %c0_i32_0 : i32, i32
  }
  func.func @transform_8(%arg0: i32, %arg1: i32, %arg2: i32) -> (i32, i32) {
    %c0_i32 = arith.constant 0 : i32
    %c0_i32_0 = arith.constant 0 : i32
    %c0_i32_1 = arith.constant 0 : i32
    return %c0_i32, %c0_i32_0 : i32, i32
  }
  func.func @transform_9(%arg0: i32, %arg1: i32, %arg2: i32) -> (i32, i32) {
    %c0_i32 = arith.constant 0 : i32
    %c0_i32_0 = arith.constant 0 : i32
    %c0_i32_1 = arith.constant 0 : i32
    return %c0_i32, %c0_i32_0 : i32, i32
  }
  func.func @transform_10(%arg0: i32, %arg1: i32, %arg2: i32) -> (i32, i32) {
    %c0_i32 = arith.constant 0 : i32
    %c0_i32_0 = arith.constant 0 : i32
    %c0_i32_1 = arith.constant 0 : i32
    return %c0_i32, %c0_i32_0 : i32, i32
  }
  func.func @transform_11(%arg0: i32, %arg1: i32, %arg2: i32) -> (i32, i32) {
    %c0_i32 = arith.constant 0 : i32
    %c0_i32_0 = arith.constant 0 : i32
    %c0_i32_1 = arith.constant 0 : i32
    return %c0_i32, %c0_i32_0 : i32, i32
  }
  func.func @transform_12(%arg0: i32, %arg1: i32, %arg2: i32) -> (i32, i32) {
    %c0_i32 = arith.constant 0 : i32
    %c0_i32_0 = arith.constant 0 : i32
    %c0_i32_1 = arith.constant 0 : i32
    return %c0_i32, %c0_i32_0 : i32, i32
  }
  func.func @transform_13(%arg0: i32, %arg1: i32, %arg2: i32) -> (i32, i32) {
    %c0_i32 = arith.constant 0 : i32
    %c0_i32_0 = arith.constant 0 : i32
    return %c0_i32, %arg2 : i32, i32
  }
  func.func @transform_14(%arg0: i32, %arg1: i32, %arg2: i32) -> (i32, i32) {
    %c0_i32 = arith.constant 0 : i32
    %c0_i32_0 = arith.constant 0 : i32
    return %c0_i32, %arg2 : i32, i32
  }
  func.func @transform_15(%arg0: i32, %arg1: i32, %arg2: i32) -> (i32, i32) {
    %c0_i32 = arith.constant 0 : i32
    %c0_i32_0 = arith.constant 0 : i32
    return %arg2, %c0_i32 : i32, i32
  }
  func.func @transform_16(%arg0: i32, %arg1: i32, %arg2: i32) -> (i32, i32) {
    %c0_i32 = arith.constant 0 : i32
    %c0_i32_0 = arith.constant 0 : i32
    %c0_i32_1 = arith.constant 0 : i32
    return %c0_i32, %c0_i32_0 : i32, i32
  }
  func.func @transform_17(%arg0: i32, %arg1: i32, %arg2: i32) -> (i32, i32, i32) {
    %c0_i32 = arith.constant 0 : i32
    %c0_i32_0 = arith.constant 0 : i32
    return %arg0, %arg1, %c0_i32 : i32, i32, i32
  }
}

</mosaic_0001>

<bundles_post_ra>
// kernel: tpu_custom_call.1
= control target key start
LH: loop header
LB: loop body
LE: loop exit
PB: predicated region body
PF: predicated region fallthrough
CT: control target
= control target key end

     0   :  { %s4435_s0 = inlined_call_operand.vmem [shape: f32[2,16,32], index: 0, kind: input, shape index: {}]   ;;  %s4436_s1 = inlined_call_operand.vmem [shape: f32[2,16,32], index: 1, kind: input, shape index: {}]   ;;  %s4437_s2 = inlined_call_operand.vmem [shape: f32[2,4,16,16], index: 2, kind: input, shape index: {}]   ;;  %s4438_s3 = inlined_call_operand.hbm [shape: f32[1,32], index: 3, kind: input, shape index: {}]   ;;  %s4439_s4 = inlined_call_operand.hbm [shape: f32[1,32], index: 4, kind: input, shape index: {}]   ;;  %s4440_s5 = inlined_call_operand.vmem [shape: f32[32,32], index: 5, kind: input, shape index: {}]   ;;  %s4441_s6 = inlined_call_operand.hbm [shape: f32[1,32], index: 6, kind: input, shape index: {}]   ;;  %s4442_s7 = inlined_call_operand.vmem [shape: f32[32,64], index: 7, kind: input, shape index: {}]   ;;  %s4443_s8 = inlined_call_operand.hbm [shape: f32[1,64], index: 8, kind: input, shape index: {}]   ;;  %s4444_s9 = inlined_call_operand.vmem [shape: f32[32,32], index: 9, kind: input, shape index: {}]   ;;  %s4445_s10 = inlined_call_operand.vmem [shape: f32[1,32], index: 10, kind: input, shape index: {}]   ;;  %s4446_s11 = inlined_call_operand.vmem [shape: f32[1,32], index: 11, kind: input, shape index: {}]   ;;  %s4447_s12 = inlined_call_operand.vmem [shape: f32[1,32], index: 12, kind: input, shape index: {}]   ;;  %s4448_s13 = inlined_call_operand.vmem [shape: f32[32,256], index: 13, kind: input, shape index: {}]   ;;  %s4449_s14 = inlined_call_operand.vmem [shape: f32[1,256], index: 14, kind: input, shape index: {}]   ;;  %s4450_s15 = inlined_call_operand.vmem [shape: f32[256,32], index: 15, kind: input, shape index: {}]   ;;  %s4451_s16 = inlined_call_operand.vmem [shape: f32[1,32], index: 16, kind: input, shape index: {}]   ;;  %s4452_s17 = inlined_call_operand.hbm [shape: f32[2,16,32], index: 17, kind: output, shape index: {}]  }
   0x1   :  { %4468 = sst [smem:[#allocation29_spill]] %s4435_s0 }
   0x2   :  { %4469 = sst [smem:[#allocation30_spill]] %s4436_s1 }
   0x3   :  { %4470 = sst [smem:[#allocation31_spill]] %s4439_s4 }
   0x4   :  { %4471 = sst [smem:[#allocation32_spill]] %s4451_s16 }
   0x5   :  { %4472 = sst [smem:[#allocation33_spill]] %s4452_s17 }
   0x6   :  { %22 = vsyncpa [#allocation8], 0 }
   0x7   :  { %23 = vsyncpa [#allocation11], 0 }
   0x8   :  { %24 = vsyncpa [#allocation14], 0 }
   0x9   :  { %25 = vsyncpa [#allocation9], 0 }
   0xa   :  { %27 = vsyncpa [#allocation9 + $0x1], 0  ;;  %s3877_s24 = smov 0   ;;  %s3879_s25 = smov 0  }
   0xb   :  { %s3881_s26 = smov 0   ;;  %s3883_s27 = smov 0  }
   0xc   :  { %s3885_s28 = smov 0   ;;  %s3887_s29 = smov 0  }
   0xd LB: > { %4473 = sst [smem:[#allocation20_spill]] %s3757_s24  ;;  %s3069_s0 = sadd.s32 4294967295, %s3777_s29   ;;  %s3777_s29 = sphi %s3887_s29, %s33_s29   ;;  %s3773_s28 = sphi %s3885_s28, %s4508_s28   ;;  %s3769_s27 = sphi %s3883_s27, %s4507_s27   ;;  %s3765_s26 = sphi %s3881_s26, %s4506_s26   ;;  %s3761_s25 = sphi %s3879_s25, %s4505_s25   ;;  %s3757_s24 = sphi %s3877_s24, %s4504_s24  }
   0xe   : > { %4474 = sst [smem:[#allocation21_spill]] %s3761_s25  ;;  %s3070_s30 = sadd.s32 4294967294, %s3777_s29  }
   0xf   : > { %4475 = sst [smem:[#allocation22_spill]] %s3765_s26  ;;  %s52_s18 = sadd.s32 1, %s3773_s28 }
  0x10   : > { %4476 = sst [smem:[#allocation23_spill]] %s3773_s28  ;;  %s452_s19 = sadd.s32 1, %s3765_s26 }
  0x11   : > { %4477 = sst [smem:[#allocation24_spill]] %s3777_s29  ;;  %p54_p0 = scmp.ge.s32.totalorder %s52_s18, 2 }
  0x12   : > { %p462_p1 = scmp.ne.s32.totalorder %s3765_s26, %s3761_s25  ;;  %p463_p2 = scmp.eq.s32.totalorder %s3069_s0, 1 }
  0x13   : > { %p468_p3 = scmp.ne.s32.totalorder %s3761_s25, %s3757_s24  ;;  %s4510_s18 = smov (%p54_p0, %s52_s18), 0 }
  0x14   : > { %4478 = sst [smem:[#allocation25_spill]] %s4510_s18  ;;  %p3917_p4 = por %p463_p2, %p462_p1 }
  0x15   : > { %p469_p5 = scmp.eq.s32.totalorder %s3070_s30, 1  ;;  %s447_s20 = ssub.s32 %s3773_s28, %s4510_s18 }
  0x16   : > { %s4479_s1 = scalar_select %p3917_p4, 1, 0 }
  0x17   : > { %p3071_p6 = scmp.ge.s32.totalorder %s3777_s29, 1  ;;  %p450_p7 = scmp.eq.s32.totalorder %s447_s20, 0 }
  0x18   : > { %4480 = sst [smem:[#allocation26_spill]] %s4479_s1  ;;  %p3924_p8 = por %p469_p5, %p468_p3 }
  0x19   : > { %p476_p9 = scmp.lt.s32.totalorder %s3777_s29, 3  ;;  %p3936_p11 = scmp.eq.s32.totalorder %s3069_s0, 0 }
  0x1a   : > { %s4481_s21 = scalar_select %p3924_p8, 1, 0 }
  0x1b   : > { %s3930_s22 = scalar_select %p450_p7, %s3765_s26, %s452_s19  }
  0x1c   : > { %4482 = sst [smem:[#allocation27_spill]] %s4481_s21  ;;  %p3932_p10 = pnand %p3071_p6, %p476_p9 }
  0x1d   : > { %4483 = sst [smem:[#allocation28_spill]] %s3930_s22  ;;  %s3779_s30 = smov [#allocation10]  }
  0x1e   : > { %s4484_s23 = scalar_select %p3932_p10, 1, 0 }
  0x1f   : > { %s4485_s24 = scalar_select %p3936_p11, 1, 0 }
  0x20   : > { %p3442_p12 = pneg %p3932_p10  ;;  %s500_s20 = sshll.u32 %s3779_s30, 4  ;;  %s501_s20 = int_to_ptr.vmem [resolvable:$true] %s500_s20 }
  0x21   : > { %s3780_s19 = smov [#allocation7]   ;;  %s4487_s4 = sld [smem:[#allocation31_spill]] }
  0x22   : > { %p3944_p13 = pnand %p3936_p11, %p3442_p12  ;;  %s489_s28 = sshll.u32 %s3780_s19, 4  ;;  %s3948_s28 = int_to_ptr.vmem [resolvable:$true] %s489_s28 }
  0x24   : > { %p3958_p1 = pneg %p3944_p13 }
  0x27   : > { %s3575_s26 = scalar_lea.hbm %s4487_s4, 16 }
  0x28   : > { %p3576_p0 = scmp.ne.s32.totalorder %s4487_s4, %s3575_s26  ;;  %p3582_p5 = scmp.lt.u32.totalorder %s3575_s26, %s4487_s4 }
  0x2a   : > { %p3578_p2 = pnand %p3958_p1, %p3576_p0 }
  0x2c   : > { %p3579_p3 = pneg %p3578_p2 }
  0x2e   : > { %p3584_p6 = pnand %p3582_p5, %p3579_p3 }
  0x30   : > { %3587 = shalt.err (!%p3584_p6)
}
  0x31   : > { %s3588_s22 = scalar_lea.vmem %s501_s20, 16  ;;  %s3595_s29 = scalar_lea.vmem %s501_s20, 32 }
  0x32   : > { %p3589_p7 = scmp.ne.s32.totalorder %s501_s20, %s3588_s22  ;;  %p3596_p8 = scmp.lt.s32.totalorder %s501_s20, %s501_s20 }
  0x33   : > { %p3597_p4 = scmp.lt.s32.totalorder %s3595_s29, %s3588_s22 }
  0x34   : > { %p3591_p9 = pnand %p3589_p7, %p3958_p1 }
  0x35   : > { %p3598_p11 = por %p3597_p4, %p3596_p8 }
  0x36   : > { %p3592_p12 = pneg %p3591_p9 }
  0x38   : > { %p3599_p10 = pnand %p3598_p11, %p3592_p12 }
  0x3a   : > { %3602 = shalt.err (!%p3599_p10)
}
  0x3b   : > { %3448 = dma.hbm_to_vmem [thread:$0]  (!%p3944_p13), %s4487_s4, 16, %s501_s20, [#allocation11]  }
  0x3c   : > { %s3603_s19 = scalar_lea.hbm %s4438_s3, 16 }
  0x3d   : > { %p3604_p0 = scmp.ne.s32.totalorder %s4438_s3, %s3603_s19  ;;  %p3610_p8 = scmp.lt.u32.totalorder %s3603_s19, %s4438_s3 }
  0x3f   : > { %p3606_p2 = pnand %p3604_p0, %p3958_p1 }
  0x41   : > { %p3607_p4 = pneg %p3606_p2 }
  0x43   : > { %p3612_p10 = pnand %p3610_p8, %p3607_p4 }
  0x45   : > { %3615 = shalt.err (!%p3612_p10)
}
  0x46   : > { %s3616_s20 = scalar_lea.vmem %s3948_s28, 16  ;;  %s3623_s16 = scalar_lea.vmem %s3948_s28, 32 }
  0x47   : > { %p3617_p11 = scmp.ne.s32.totalorder %s3948_s28, %s3616_s20  ;;  %p3624_p6 = scmp.lt.s32.totalorder %s3948_s28, %s3948_s28 }
  0x48   : > { %p3625_p7 = scmp.lt.s32.totalorder %s3623_s16, %s3616_s20 }
  0x49   : > { %p3619_p3 = pnand %p3617_p11, %p3958_p1 }
  0x4a   : > { %p3626_p9 = por %p3625_p7, %p3624_p6 }
  0x4b   : > { %p3620_p5 = pneg %p3619_p3 }
  0x4d   : > { %p3627_p12 = pnand %p3626_p9, %p3620_p5 }
  0x4f   : > { %3630 = shalt.err (!%p3627_p12)
}
  0x50   : > { %3445 = dma.hbm_to_vmem [thread:$0]  (!%p3944_p13), %s4438_s3, 16, %s3948_s28, [#allocation8]  }
  0x51   : > { %s3781_s0 = smov [#allocation12]   ;;  %s3782_s26 = smov [#allocation13]  }
  0x52   : > { %s514_s17 = sshll.u32 %s3781_s0, 4  ;;  %s528_s19 = sshll.u32 %s3782_s26, 4  ;;  %s515_s17 = int_to_ptr.vmem [resolvable:$true] %s514_s17  ;;  %s529_s19 = int_to_ptr.vmem [resolvable:$true] %s528_s19 }
  0x53   : > { %s3631_s20 = scalar_lea.hbm %s4441_s6, 16 }
  0x54   : > { %p3632_p0 = scmp.ne.s32.totalorder %s4441_s6, %s3631_s20  ;;  %p3638_p8 = scmp.lt.u32.totalorder %s3631_s20, %s4441_s6 }
  0x56   : > { %p3634_p2 = pnand %p3632_p0, %p3958_p1 }
  0x58   : > { %p3635_p4 = pneg %p3634_p2 }
  0x5a   : > { %p3640_p10 = pnand %p3638_p8, %p3635_p4 }
  0x5c   : > { %3643 = shalt.err (!%p3640_p10)
}
  0x5d   : > { %s3644_s28 = scalar_lea.vmem %s515_s17, 16  ;;  %s3651_s21 = scalar_lea.vmem %s515_s17, 32 }
  0x5e   : > { %p3645_p11 = scmp.ne.s32.totalorder %s515_s17, %s3644_s28  ;;  %p3652_p6 = scmp.lt.s32.totalorder %s515_s17, %s515_s17 }
  0x5f   : > { %p3653_p7 = scmp.lt.s32.totalorder %s3651_s21, %s3644_s28 }
  0x60   : > { %p3647_p3 = pnand %p3645_p11, %p3958_p1 }
  0x61   : > { %p3654_p9 = por %p3653_p7, %p3652_p6 }
  0x62   : > { %p3648_p5 = pneg %p3647_p3 }
  0x64   : > { %p3655_p12 = pnand %p3654_p9, %p3648_p5 }
  0x66   : > { %3658 = shalt.err (!%p3655_p12)
}
  0x67   : > { %3451 = dma.hbm_to_vmem [thread:$0]  (!%p3944_p13), %s4441_s6, 16, %s515_s17, [#allocation11]  }
  0x68   : > { %s3659_s22 = scalar_lea.hbm %s4443_s8, 16 }
  0x69   : > { %p3660_p0 = scmp.ne.s32.totalorder %s4443_s8, %s3659_s22  ;;  %p3666_p8 = scmp.lt.u32.totalorder %s3659_s22, %s4443_s8 }
  0x6b   : > { %p3662_p2 = pnand %p3660_p0, %p3958_p1 }
  0x6d   : > { %p3663_p4 = pneg %p3662_p2 }
  0x6f   : > { %p3668_p10 = pnand %p3666_p8, %p3663_p4 }
  0x71   : > { %3671 = shalt.err (!%p3668_p10)
}
  0x72   : > { %s3672_s28 = scalar_lea.vmem %s529_s19, 16  ;;  %s3679_s17 = scalar_lea.vmem %s529_s19, 32 }
  0x73   : > { %p3673_p11 = scmp.ne.s32.totalorder %s529_s19, %s3672_s28  ;;  %p3680_p6 = scmp.lt.s32.totalorder %s529_s19, %s529_s19 }
  0x74   : > { %p3681_p7 = scmp.lt.s32.totalorder %s3679_s17, %s3672_s28 }
  0x75   : > { %p3675_p3 = pnand %p3673_p11, %p3958_p1 }
  0x76   : > { %p3682_p9 = por %p3681_p7, %p3680_p6 }
  0x77   : > { %p3676_p5 = pneg %p3675_p3 }
  0x79   : > { %p3683_p12 = pnand %p3682_p9, %p3676_p5 }
  0x7b   : > { %3686 = shalt.err (!%p3683_p12)
}
  0x7c   : > { %3454 = dma.hbm_to_vmem [thread:$0]  (!%p3944_p13), %s4443_s8, 16, %s529_s19, [#allocation14]  }
  0x7d   : > { %p4489_p0 = scmp.ne.s32.totalorder %s4484_s23, 0 }
  0x7e   : > { %p4490_p2 = scmp.ne.s32.totalorder (!%p4489_p0), %s4485_s24, 0 }
  0x7f   : > { %616 = sbr.rel (%p4489_p0) target bundleno = 3042 (0xbe2), region = 88 }
  0x86   : > { %3740 = dma.done.wait (%p4490_p2), [#allocation8], 16  }
  0x87   : > { %3742 = vsyncadd (%p4490_p2), [#allocation8], 4294967280 }
  0x88   : > { %3744 = dma.done.wait (%p4490_p2), [#allocation11], 32  }
  0x89   : > { %3746 = vsyncadd (%p4490_p2), [#allocation11], 4294967264 }
  0x8a   : > { %3748 = dma.done.wait (%p4490_p2), [#allocation14], 16  }
  0x8b   : > { %3750 = vsyncadd (%p4490_p2), [#allocation14], 4294967280  ;;  %p713_p13 = scmp.lt.s32.totalorder %s3769_s27, 1  ;;  %s4491_s0 = sld [smem:[#allocation30_spill]]  ;;  %vm765_vm0 = vcmask 261120   ;;  %v809_v28 = vld [vmem:[%s4442_s7] sm:$0xff] }
  0x8c   : > { %s4492_s29 = sld [smem:[#allocation29_spill]]  ;;  %v810_v29 = vld [vmem:[%s4442_s7 + $0x8] sm:$0xff]  ;;  %v811_v31 = vld [vmem:[%s4442_s7 + $0x10] sm:$0xff]  ;;  %v812_v32 = vld [vmem:[%s4442_s7 + $0x18] sm:$0xff]  ;;  %vm1189_vm1 = vcmask 64512   ;;  %vm1874_vm3 = vcmask 130048  }
  0x8d   : > { %s4050_s18 = scalar_select %p713_p13, %s3769_s27, 1  ;;  %v3320_v30 = vpack.c.bf16 %v810_v29, %v809_v28  ;;  %v3324_v33 = vpack.c.bf16 %v812_v32, %v811_v31  ;;  %v1257_v34 = vld [vmem:[%s4440_s5] sm:$0xff]  ;;  %v1258_v35 = vld [vmem:[%s4440_s5 + $0x8] sm:$0xff]  ;;  %v3092_v50 = vld [vmem:[#allocation7] ss:$0 sm:$0xff] }
  0x8e   : > { %v3328_v36 = vpack.c.bf16 %v1258_v35, %v1257_v34  ;;  %v3093_v52 = vld [vmem:[#allocation10] ss:$0 sm:$0xff]  ;;  %v1260_v60 = vld [vmem:[%s4440_s5 + $0x18] sm:$0xff]  ;;  %vm4116_vm2 = vmpackc.low %vm1189_vm1, %vm1189_vm1  ;;  %s3142_s17 = sshll.u32 %s3769_s27, 8  ;;  %s4498_s19 = sld [smem:[#allocation33_spill]] }
  0x8f   : > { %s3139_s23 = sshll.u32 %s4050_s18, 4  ;;  %3321 = vmatprep.subr.bf16.mxu1 %v3320_v30  ;;  %v1259_v59 = vld [vmem:[%s4440_s5 + $0x10] sm:$0xff]  ;;  %s3141_s24 = sshll.u32 %s4050_s18, 6 }
  0x90   : > { %3323 = vmatpush3.bf16.msra.mxu1 %v3320_v30  ;;  %s4153_s28 = scalar_lea.vmem %s4437_s2, %s3141_s24  ;;  %s4497_s18 = sld [smem:[#allocation26_spill]] }
  0x91   : > { %s726_s25 = scalar_lea.vmem %s4491_s0, %s3139_s23  ;;  %3325 = vmatprep.subr.bf16.mxu1 %v3324_v33  ;;  %s3784_s26 = smov [#allocation15]  }
  0x92   : > { %s720_s20 = scalar_lea.vmem %s4492_s29, %s3139_s23  ;;  %v761_v0 = vld [vmem:[%s726_s25] sm:$0xff]  ;;  %v762_v2 = vld [vmem:[%s726_s25 + $0x8] sm:$0xff]  ;;  %s4495_s29 = sld [smem:[#allocation21_spill]] }
  0x93   : > { %v4059_v1 = vld [vmem:[%s720_s20] sm:$0xff]  ;;  %v766_v3 = vsel %vm765_vm0, %v761_v0, 0.0  ;;  %v4064_v5 = vld [vmem:[%s720_s20 + $0x8] sm:$0xff]  ;;  %v769_v6 = vsel %vm765_vm0, %v762_v2, 0.0  ;;  %s3691_s22 = sshll.u32 %s3784_s26, 4  ;;  %s3692_s22 = int_to_ptr.vmem [resolvable:$false] %s3691_s22 }
  0x94   : > { %v1214_v4 = vsel %vm765_vm0, %v4059_v1, 0.0  ;;  %767 = vadd.xlane.f32.xlu0 %v766_v3  ;;  %v1217_v7 = vsel %vm765_vm0, %v4064_v5, 0.0  ;;  %3327 = vmatpush3.bf16.msra.mxu1 %v3324_v33  ;;  %v3332_v3 = vpack.c.bf16 %v1260_v60, %v1259_v59  ;;  %s4384_s0 = scalar_lea.hbm %s4498_s19, %s3142_s17 }
  0x95   : > { %1215 = vadd.xlane.f32.xlu1 %v1214_v4  ;;  %3329 = vmatprep.subr.bf16.mxu1 %v3328_v36 }
  0x96   : > { %p4499_p4 = scmp.ne.s32.totalorder %s4497_s18, 0 }
  0x98   : > { %770 = vadd.xlane.f32.xlu0 %v769_v6  ;;  %s709_s20 = sand.u32 1, %s4495_s29   ;;  %s3693_s29 = scalar_lea.vmem %s3692_s22, 512 }
  0x99   : > { %1218 = vadd.xlane.f32.xlu1 %v1217_v7  ;;  %s3085_s24 = sshll.u32 %s709_s20, 4  ;;  %s4389_s27 = scalar_lea.sflag [#allocation9], %s709_s20 }
  0x9a   : > { %s711_s21 = scalar_lea.vmem [#allocation15], %s3085_s24 }
  0x9b   : > { %s2874_s4 = sshll.u32 %s711_s21, 4  ;;  %s4386_s4 = int_to_ptr.vmem [resolvable:$true] %s2874_s4 }
  0x9c   : > { %s3687_s25 = scalar_lea.vmem %s4386_s4, 256  ;;  %p3694_p11 = scmp.lt.s32.totalorder %s4386_s4, %s3692_s22 }
  0x9d   : > { %p3688_p1 = scmp.ne.s32.totalorder %s4386_s4, %s3687_s25  ;;  %p3695_p3 = scmp.lt.s32.totalorder %s3693_s29, %s3687_s25 }
  0x9f   : > { %p3689_p8 = pnand %p3688_p1, %p4499_p4  ;;  %p3696_p5 = por %p3695_p3, %p3694_p11 }
  0xa1   : > { %p3690_p10 = pneg %p3689_p8 }
  0xa3   : > { %p3697_p6 = pnand %p3696_p5, %p3690_p10 }
 0x121   : > { %v768_v8 = vpop.xlane.xlu0 %767 }
 0x122   : > { %v1216_v9 = vpop.xlane.xlu1 %1215  ;;  %v773_v10 = vmul.f32 0.03125, %v768_v8  ;;  %v3094_v8 = vld [vmem:[#allocation13] ss:$0 sm:$0xff] }
 0x123   : > { %v1221_v11 = vmul.f32 0.03125, %v1216_v9 }
 0x124   : > { %v775_v12 = vsub.f32 %v761_v0, %v773_v10 }
 0x125   : > { %v1223_v13 = vsub.f32 %v4059_v1, %v1221_v11  ;;  %v771_v14 = vpop.xlane.xlu0 %770 }
 0x126   : > { %v1219_v15 = vpop.xlane.xlu1 %1218  ;;  %v774_v16 = vmul.f32 0.03125, %v771_v14  ;;  %v777_v18 = vmul.f32 %v775_v12, %v775_v12 }
 0x127   : > { %v1222_v17 = vmul.f32 0.03125, %v1219_v15  ;;  %v1225_v19 = vmul.f32 %v1223_v13, %v1223_v13 }
 0x128   : > { %v776_v20 = vsub.f32 %v762_v2, %v774_v16  ;;  %v779_v22 = vsel %vm765_vm0, %v777_v18, 0.0 }
 0x129   : > { %v1224_v21 = vsub.f32 %v4064_v5, %v1222_v17  ;;  %780 = vadd.xlane.f32.xlu0 %v779_v22  ;;  %v1227_v23 = vsel %vm765_vm0, %v1225_v19, 0.0 }
 0x12a   : > { %v778_v24 = vmul.f32 %v776_v20, %v776_v20 }
 0x12b   : > { %v1226_v25 = vmul.f32 %v1224_v21, %v1224_v21 }
 0x12c   : > { %v782_v26 = vsel %vm765_vm0, %v778_v24, 0.0 }
 0x12d   : > { %1228 = vadd.xlane.f32.xlu0 %v1227_v23  ;;  %783 = vadd.xlane.f32.xlu1 %v782_v26  ;;  %v1230_v27 = vsel %vm765_vm0, %v1226_v25, 0.0 }
 0x131   : > { %1231 = vadd.xlane.f32.xlu1 %v1230_v27 }
 0x1b6   : > { %v781_v37 = vpop.xlane.xlu0 %780 }
 0x1b7   : > { %v785_v38 = vmul.f32 0.03125, %v781_v37 }
 0x1b9   : > { %v787_v39 = vadd.f32 1e-05, %v785_v38 }
 0x1ba   : > { %v784_v40 = vpop.xlane.xlu1 %783  ;;  %v1229_v41 = vpop.xlane.xlu0 %1228 }
 0x1bb   : > { %3523 = vrsqrt.f32 %v787_v39  ;;  %v786_v42 = vmul.f32 0.03125, %v784_v40  ;;  %v1233_v43 = vmul.f32 0.03125, %v1229_v41 }
 0x1bd   : > { %v788_v44 = vadd.f32 1e-05, %v786_v42  ;;  %v1235_v45 = vadd.f32 1e-05, %v1233_v43 }
 0x1be   : > { %v1232_v46 = vpop.xlane.xlu1 %1231 }
 0x1bf   : > { %3525 = vrsqrt.f32 %v788_v44  ;;  %v1234_v47 = vmul.f32 0.03125, %v1232_v46 }
 0x1c0   : > { %3527 = vrsqrt.f32 %v1235_v45 }
 0x1c1   : > { %v1236_v48 = vadd.f32 1e-05, %v1234_v47 }
 0x1c3   : > { %3529 = vrsqrt.f32 %v1236_v48 }
 0x1c5   : > { %v3524_v49 = vpop.eup %3523 }
 0x1c6   : > { %v791_v51 = vmul.f32 %v3524_v49, %v775_v12 }
 0x1c8   : > { %v799_v53 = vmul.f32 %v3092_v50, %v791_v51 }
 0x1c9   : > { %v3526_v54 = vpop.eup %3525 }
 0x1ca   : > { %v3528_v55 = vpop.eup %3527  ;;  %v792_v56 = vmul.f32 %v3526_v54, %v776_v20  ;;  %v807_v57 = vadd.f32 %v3093_v52, %v799_v53 }
 0x1cb   : > { %v1239_v58 = vmul.f32 %v3528_v55, %v1223_v13  ;;  %v3099_v13 = vld [vmem:[#allocation12] ss:$0 sm:$0xff] }
 0x1cc   : > { %v800_v61 = vmul.f32 %v3092_v50, %v792_v56  ;;  %3239 = vmatprep.mubr.msk.f32.mxu1 %vm765_vm0, %v807_v57 }
 0x1cd   : > { %v3530_v62 = vpop.eup %3529  ;;  %v1247_v63 = vmul.f32 %v3092_v50, %v1239_v58 }
 0x1ce   : > { %v1240_v0 = vmul.f32 %v3530_v62, %v1224_v21  ;;  %v808_v2 = vadd.f32 %v3093_v52, %v800_v61  ;;  %v1518_v61 = vld [vmem:[%s4153_s28 + $0x8] sm:$0xff]  ;;  %v1517_v62 = vld [vmem:[%s4153_s28] sm:$0xff] }
 0x1cf   : > { %v1255_v4 = vadd.f32 %v3093_v52, %v1247_v63 }
 0x1d0   : > { %3240 = vmatmul.mubr.msk.f32.vlgmr.msra.gmra.mrb[0].mxu1 %vm765_vm0, %v808_v2  ;;  %v1248_v6 = vmul.f32 %v3092_v50, %v1240_v0 }
 0x1d1   : > { %3331 = vmatpush3.bf16.msra.mxu1 %v3328_v36  ;;  %3250 = vmatprep.mubr.msk.f32.mxu1 %vm765_vm0, %v1255_v4 }
 0x1d2   : > { %3333 = vmatprep.subr.bf16.mxu1 %v3332_v3  ;;  %v1256_v7 = vadd.f32 %v3093_v52, %v1248_v6 }
 0x1d5   : > { %3335 = vmatpush3.bf16.msra.mxu1 %v3332_v3 }
 0x1d8   : > { %3251 = vmatmul.mubr.msk.f32.vlgmr.msra.gmra.mrb[2].mxu1 %vm765_vm0, %v1256_v7  ;;  %v1520_v7 = vld [vmem:[%s4153_s28 + $0x18] sm:$0xff] }
 0x2a3   : > { %v3241_v9 = vpop.f32.mrb[0].mxu1 }
 0x2a4   : > { %v892_v10 = vpop.f32.mrb[1].mxu1  ;;  %v898_v12 = vadd.f32 %v3241_v9, %v3094_v8 }
 0x2a5   : > { %v893_v11 = vadd.f32 %v3094_v8, %v892_v10  ;;  %v1519_v8 = vld [vmem:[%s4153_s28 + $0x10] sm:$0xff]  ;;  %v1522_v10 = vld [vmem:[%s4153_s28 + $0x28] sm:$0xff] }
 0x2a7   : > { %901 = vxpose.xlu0.b32.start [1/2] (short) (narrow) %v893_v11, 64 }
 0x2ab   : > { %v3252_v14 = vpop.f32.mrb[2].mxu1  ;;  %902 = vxpose.xlu0.b32.end [2/2] (short) (narrow) %v898_v12, 64 }
 0x2ac   : > { %v1340_v15 = vpop.f32.mrb[3].mxu1  ;;  %v1346_v17 = vadd.f32 %v3252_v14, %v3099_v13 }
 0x2ad   : > { %v1341_v16 = vadd.f32 %v3099_v13, %v1340_v15  ;;  %v1521_v13 = vld [vmem:[%s4153_s28 + $0x20] sm:$0xff] }
 0x2af   : > { %1349 = vxpose.xlu1.b32.start [1/2] (short) (narrow) %v1341_v16, 32 }
 0x2b3   : > { %1350 = vxpose.xlu1.b32.end [2/2] (short) (narrow) %v1346_v17, 32 }
 0x327   : > { %v917_v18 = vpop.trf.xlu0 }
 0x328   : > { %933 = vxpose.xlu0.b32.start.end [1/1] (short) (narrow) %v917_v18, 16 }
 0x32b   : > { %v918_v19 = vpop.trf.xlu0 }
 0x32c   : > { %965 = vxpose.xlu1.b32.start.end [1/1] (short) (narrow) %v918_v19, 16 }
 0x32f   : > { %v919_v20 = vpop.trf.xlu0  ;;  %v1365_v21 = vpop.trf.xlu1 }
 0x330   : > { %1381 = vxpose.xlu0.b32.start.end [1/1] (short) (narrow) %v1365_v21, 16 }
 0x331   : > { %997 = vxpose.xlu1.b32.start.end [1/1] (short) (narrow) %v919_v20, 16 }
 0x333   : > { %v920_v22 = vpop.trf.xlu0  ;;  %v1366_v23 = vpop.trf.xlu1 }
 0x336   : > { %1029 = vxpose.xlu1.b32.start.end [1/1] (short) (narrow) %v920_v22, 16  ;;  %v1524_v22 = vld [vmem:[%s4153_s28 + $0x38] sm:$0xff] }
 0x337   : > { %v1367_v24 = vpop.trf.xlu1  ;;  %v921_v25 = vpop.trf.xlu0 }
 0x338   : > { %1445 = vxpose.xlu0.b32.start.end [1/1] (short) (narrow) %v1367_v24, 16 }
 0x33b   : > { %1413 = vxpose.xlu1.b32.start.end [1/1] (short) (narrow) %v1366_v23, 16  ;;  %v1368_v26 = vpop.trf.xlu1  ;;  %v4103_v27 = vpop.trf.xlu0  ;;  %v1523_v23 = vld [vmem:[%s4153_s28 + $0x30] sm:$0xff]  ;;  %s4496_s28 = sld [smem:[#allocation32_spill]] }
 0x33d   : > { %1061 = vxpose.xlu0.b32.start.end [1/1] (short) (narrow) %v921_v25, 16 }
 0x33f   : > { %v4105_v28 = vpop.trf.xlu0 }
 0x340   : > { %1477 = vxpose.xlu1.b32.start.end [1/1] (short) (narrow) %v1368_v26, 16 }
 0x343   : > { %v4107_v29 = vpop.trf.xlu0 }
 0x3a8   : > { %v949_v30 = vpop.trf.xlu0 }
 0x3a9   : > { %1190 = vst.msk [vmem:[#allocation2] sm:$0xff] %vm1189_vm1, %v949_v30 }
 0x3ac   : > { %v981_v31 = vpop.trf.xlu1  ;;  %v950_v32 = vpop.trf.xlu0 }
 0x3ad   : > { %1192 = vst.msk [vmem:[#allocation2 + $0x10] sm:$0xff] %vm1189_vm1, %v981_v31  ;;  %1191 = vst.msk [vmem:[#allocation2 + $0x8] sm:$0xff] %vm1189_vm1, %v950_v32 }
 0x3b0   : > { %v982_v33 = vpop.trf.xlu1  ;;  %v1397_v34 = vpop.trf.xlu0  ;;  %v1509_v36 = vld [vmem:[#allocation2] sm:$0xff] }
 0x3b1   : > { %1193 = vst.msk [vmem:[#allocation2 + $0x18] sm:$0xff] %vm1189_vm1, %v982_v33  ;;  %3257 = vmatprep.mubr.msk.f32.mxu1 %vm1189_vm1, %v1397_v34 }
 0x3b4   : > { %v1013_v35 = vpop.trf.xlu1  ;;  %v1510_v37 = vld [vmem:[#allocation2 + $0x8] sm:$0xff]  ;;  %v1398_v39 = vpop.trf.xlu0  ;;  %v1511_v42 = vld [vmem:[#allocation2 + $0x10] sm:$0xff] }
 0x3b5   : > { %1194 = vst.msk [vmem:[#allocation2 + $0x20] sm:$0xff] %vm1189_vm1, %v1013_v35  ;;  %v3336_v40 = vpack.c.bf16 %v1510_v37, %v1509_v36 }
 0x3b7   : > { %3338 = vmatprep.subr.msk.bf16.mxu1 %vm4116_vm2, %v3336_v40 }
 0x3b8   : > { %v1014_v41 = vpop.trf.xlu1  ;;  %3341 = vmatpush3.bf16.xpose.msk.msra.mxu1 %vm4116_vm2, %v3336_v40  ;;  %v1512_v43 = vld [vmem:[#allocation2 + $0x18] sm:$0xff]  ;;  %v1461_v44 = vpop.trf.xlu0 }
 0x3b9   : > { %1195 = vst.msk [vmem:[#allocation2 + $0x28] sm:$0xff] %vm1189_vm1, %v1014_v41  ;;  %v3342_v45 = vpack.c.bf16 %v1512_v43, %v1511_v42  ;;  %3271 = vmatprep.mubr.msk.f32.mxu0 %vm1189_vm1, %v1461_v44 }
 0x3bb   : > { %3344 = vmatprep.subr.msk.bf16.mxu1 %vm4116_vm2, %v3342_v45 }
 0x3bc   : > { %v1045_v46 = vpop.trf.xlu1  ;;  %v1513_v48 = vld [vmem:[#allocation2 + $0x20] sm:$0xff]  ;;  %v1462_v53 = vpop.trf.xlu0 }
 0x3bd   : > { %1196 = vst.msk [vmem:[#allocation2 + $0x30] sm:$0xff] %vm1189_vm1, %v1045_v46 }
 0x3bf   : > { %3258 = vmatmul.mubr.msk.f32.vlgmr.msra.gmra.mrb[4].mxu1 %vm1189_vm1, %v1398_v39 }
 0x3c0   : > { %v1046_v47 = vpop.trf.xlu1  ;;  %3347 = vmatpush3.bf16.xpose.msk.msra.mxu1 %vm4116_vm2, %v3342_v45  ;;  %v1514_v49 = vld [vmem:[#allocation2 + $0x28] sm:$0xff]  ;;  %v1077_v59 = vpop.trf.xlu0 }
 0x3c1   : > { %1197 = vst.msk [vmem:[#allocation2 + $0x38] sm:$0xff] %vm1189_vm1, %v1046_v47  ;;  %v3348_v50 = vpack.c.bf16 %v1514_v49, %v1513_v48  ;;  %1198 = vst.msk [vmem:[#allocation3] sm:$0xff] %vm1189_vm1, %v1077_v59 }
 0x3c3   : > { %3350 = vmatprep.subr.msk.bf16.mxu0 %vm4116_vm2, %v3348_v50 }
 0x3c4   : > { %3353 = vmatpush3.bf16.xpose.msk.msra.mxu0 %vm4116_vm2, %v3348_v50  ;;  %v1429_v51 = vpop.trf.xlu1  ;;  %v1515_v54 = vld [vmem:[#allocation2 + $0x30] sm:$0xff]  ;;  %v1078_v60 = vpop.trf.xlu0 }
 0x3c5   : > { %3264 = vmatprep.mubr.msk.f32.mxu1 %vm1189_vm1, %v1429_v51  ;;  %1199 = vst.msk [vmem:[#allocation3 + $0x8] sm:$0xff] %vm1189_vm1, %v1078_v60 }
 0x3c8   : > { %v1430_v52 = vpop.trf.xlu1  ;;  %v1516_v55 = vld [vmem:[#allocation2 + $0x38] sm:$0xff]  ;;  %v1963_v34 = vld [vmem:[#allocation3] sm:$0xff] }
 0x3c9   : > { %3265 = vmatmul.mubr.msk.f32.vlgmr.msra.gmra.mrb[6].mxu1 %vm1189_vm1, %v1430_v52  ;;  %v3354_v56 = vpack.c.bf16 %v1516_v55, %v1515_v54 }
 0x3cb   : > { %3272 = vmatmul.mubr.msk.f32.vlgmr.msra.gmra.mrb[0].mxu0 %vm1189_vm1, %v1462_v53  ;;  %3356 = vmatprep.subr.msk.bf16.mxu1 %vm4116_vm2, %v3354_v56 }
 0x3cc   : > { %3359 = vmatpush3.bf16.xpose.msk.msra.mxu1 %vm4116_vm2, %v3354_v56  ;;  %v1493_v57 = vpop.trf.xlu1  ;;  %v1964_v35 = vld [vmem:[#allocation3 + $0x8] sm:$0xff] }
 0x3cd   : > { %3278 = vmatprep.mubr.msk.f32.mxu1 %vm1189_vm1, %v1493_v57  ;;  %v3360_v36 = vpack.c.bf16 %v1964_v35, %v1963_v34 }
 0x3cf   : > { %3361 = vmatprep.subr.bf16.mxu0 %v3360_v36 }
 0x3d0   : > { %v1494_v58 = vpop.trf.xlu1  ;;  %3363 = vmatpush3.bf16.msra.mxu0 %v3360_v36 }
 0x3d3   : > { %3279 = vmatmul.mubr.msk.f32.vlgmr.msra.gmra.mrb[8].mxu1 %vm1189_vm1, %v1494_v58 }
 0x492   : > { %v3259_v63 = vpop.f32.mrb[4].mxu1 }
 0x493   : > { %v1610_v0 = vadd.f32 %v3259_v63, %v1518_v61  ;;  %v1604_v2 = vpop.f32.mrb[5].mxu1 }
 0x494   : > { %v1605_v3 = vadd.f32 %v1604_v2, %v1517_v62 }
 0x495   : > { %v1878_v4 = vsel %vm1874_vm3, %v1610_v0, -inf }
 0x496   : > { %1879 = vmax.xlane.f32.xlu1 %v1878_v4  ;;  %v1875_v6 = vsel %vm1874_vm3, %v1605_v3, -inf }
 0x497   : > { %1876 = vmax.xlane.f32.xlu0 %v1875_v6 }
 0x49c   : > { %v3266_v9 = vpop.f32.mrb[6].mxu1 }
 0x49d   : > { %v1697_v11 = vadd.f32 %v3266_v9, %v1520_v7  ;;  %v1691_v12 = vpop.f32.mrb[7].mxu1 }
 0x49e   : > { %v1692_v14 = vadd.f32 %v1691_v12, %v1519_v8  ;;  %v3273_v15 = vpop.f32.mrb[0].mxu0 }
 0x49f   : > { %v1784_v16 = vadd.f32 %v3273_v15, %v1522_v10  ;;  %v1778_v17 = vpop.f32.mrb[1].mxu0  ;;  %v1884_v18 = vsel %vm1874_vm3, %v1697_v11, -inf }
 0x4a0   : > { %v1779_v19 = vadd.f32 %v1778_v17, %v1521_v13  ;;  %1885 = vmax.xlane.f32.xlu1 %v1884_v18  ;;  %v1881_v21 = vsel %vm1874_vm3, %v1692_v14, -inf }
 0x4a1   : > { %v1890_v24 = vsel %vm1874_vm3, %v1784_v16, -inf }
 0x4a2   : > { %v1887_v20 = vsel %vm1874_vm3, %v1779_v19, -inf }
 0x4a3   : > { %1888 = vmax.xlane.f32.xlu0 %v1887_v20 }
 0x4a4   : > { %1882 = vmax.xlane.f32.xlu1 %v1881_v21 }
 0x4a6   : > { %v3280_v25 = vpop.f32.mrb[8].mxu1 }
 0x4a7   : > { %v1871_v26 = vadd.f32 %v3280_v25, %v1524_v22  ;;  %v1865_v30 = vpop.f32.mrb[9].mxu1 }
 0x4a8   : > { %v1866_v31 = vadd.f32 %v1865_v30, %v1523_v23  ;;  %1891 = vmax.xlane.f32.xlu1 %v1890_v24 }
 0x4a9   : > { %v1896_v32 = vsel %vm1874_vm3, %v1871_v26, -inf }
 0x4aa   : > { %v1893_v33 = vsel %vm1874_vm3, %v1866_v31, -inf }
 0x4ab   : > { %1894 = vmax.xlane.f32.xlu0 %v1893_v33 }
 0x4ac   : > { %1897 = vmax.xlane.f32.xlu1 %v1896_v32 }
 0x4d8   : > { %1125 = vxpose.xlu0.b32.start.end [1/1] (short) (narrow) %v4105_v28, 16 }
 0x523   : > { %v1880_v37 = vpop.xlane.xlu1 %1879 }
 0x524   : > { %v1900_v38 = vsub.f32 %v1610_v0, %v1880_v37  ;;  %v1877_v39 = vpop.xlane.xlu0 %1876 }
 0x525   : > { %v1899_v40 = vsub.f32 %v1605_v3, %v1877_v39 }
 0x526   : > { %v1909_v41 = vmul.f32 1.442695, %v1900_v38 }
 0x527   : > { %v1907_v42 = vmul.f32 1.442695, %v1899_v40 }
 0x528   : > { %3531 = vpow2.f32 %v1909_v41 }
 0x529   : > { %3533 = vpow2.f32 %v1907_v42 }
 0x52d   : > { %v1886_v43 = vpop.xlane.xlu1 %1885 }
 0x52e   : > { %v1902_v44 = vsub.f32 %v1697_v11, %v1886_v43 }
 0x530   : > { %v1913_v45 = vmul.f32 1.442695, %v1902_v44  ;;  %v1889_v46 = vpop.xlane.xlu0 %1888 }
 0x531   : > { %v1903_v47 = vsub.f32 %v1779_v19, %v1889_v46  ;;  %v1883_v48 = vpop.xlane.xlu1 %1882 }
 0x532   : > { %v3532_v49 = vpop.eup %3531  ;;  %3535 = vpow2.f32 %v1913_v45  ;;  %v1901_v50 = vsub.f32 %v1692_v14, %v1883_v48 }
 0x533   : > { %v3534_v51 = vpop.eup %3533  ;;  %v1926_v28 = vsel %vm1874_vm3, %v3532_v49, 0.0  ;;  %v1915_v52 = vmul.f32 1.442695, %v1903_v47 }
 0x534   : > { %v1911_v53 = vmul.f32 1.442695, %v1901_v50  ;;  %1927 = vadd.xlane.f32.xlu1 %v1926_v28  ;;  %v1923_v54 = vsel %vm1874_vm3, %v3534_v51, 0.0 }
 0x535   : > { %v1892_v55 = vpop.xlane.xlu1 %1891  ;;  %1924 = vadd.xlane.f32.xlu0 %v1923_v54 }
 0x536   : > { %3537 = vpow2.f32 %v1911_v53  ;;  %v1904_v56 = vsub.f32 %v1784_v16, %v1892_v55 }
 0x537   : > { %3539 = vpow2.f32 %v1915_v52 }
 0x538   : > { %v1917_v57 = vmul.f32 1.442695, %v1904_v56  ;;  %v1895_v58 = vpop.xlane.xlu0 %1894 }
 0x539   : > { %v1905_v59 = vsub.f32 %v1866_v31, %v1895_v58  ;;  %v1898_v60 = vpop.xlane.xlu1 %1897 }
 0x53a   : > { %3541 = vpow2.f32 %v1917_v57  ;;  %v1906_v61 = vsub.f32 %v1871_v26, %v1898_v60 }
 0x53b   : > { %v1919_v62 = vmul.f32 1.442695, %v1905_v59 }
 0x53c   : > { %v4174_v63 = vpop.eup %3535  ;;  %v1921_v0 = vmul.f32 1.442695, %v1906_v61  ;;  %v2455_v61 = vld [vmem:[%s4444_s9] sm:$0xff] }
 0x53d   : > { %3543 = vpow2.f32 %v1919_v62  ;;  %v1932_v2 = vsel %vm1874_vm3, %v4174_v63, 0.0  ;;  %v2456_v62 = vld [vmem:[%s4444_s9 + $0x8] sm:$0xff] }
 0x53e   : > { %3545 = vpow2.f32 %v1921_v0  ;;  %1933 = vadd.xlane.f32.xlu1 %v1932_v2  ;;  %v2457_v2 = vld [vmem:[%s4444_s9 + $0x10] sm:$0xff] }
 0x540   : > { %v3538_v3 = vpop.eup %3537 }
 0x541   : > { %v1929_v4 = vsel %vm1874_vm3, %v3538_v3, 0.0  ;;  %v3540_v6 = vpop.eup %3539 }
 0x542   : > { %1930 = vadd.xlane.f32.xlu0 %v1929_v4  ;;  %v1935_v9 = vsel %vm1874_vm3, %v3540_v6, 0.0 }
 0x544   : > { %v3542_v7 = vpop.eup %3541 }
 0x545   : > { %v1938_v8 = vsel %vm1874_vm3, %v3542_v7, 0.0 }
 0x546   : > { %1939 = vadd.xlane.f32.xlu1 %v1938_v8  ;;  %1936 = vadd.xlane.f32.xlu0 %v1935_v9 }
 0x547   : > { %v4181_v10 = vpop.eup %3543 }
 0x548   : > { %v4183_v11 = vpop.eup %3545  ;;  %v1941_v12 = vsel %vm1874_vm3, %v4181_v10, 0.0 }
 0x549   : > { %v1944_v13 = vsel %vm1874_vm3, %v4183_v11, 0.0 }
 0x54a   : > { %1945 = vadd.xlane.f32.xlu1 %v1944_v13  ;;  %1942 = vadd.xlane.f32.xlu0 %v1941_v12 }
 0x558   : > { %v1141_v14 = vpop.trf.xlu0 }
 0x559   : > { %1202 = vst.msk [vmem:[#allocation3 + $0x20] sm:$0xff] %vm1189_vm1, %v1141_v14 }
 0x55c   : > { %v1142_v15 = vpop.trf.xlu0 }
 0x55d   : > { %1203 = vst.msk [vmem:[#allocation3 + $0x28] sm:$0xff] %vm1189_vm1, %v1142_v15 }
 0x560   : > { %v1967_v16 = vld [vmem:[#allocation3 + $0x20] sm:$0xff] }
 0x564   : > { %v1968_v17 = vld [vmem:[#allocation3 + $0x28] sm:$0xff] }
 0x565   : > { %v3368_v18 = vpack.c.bf16 %v1968_v17, %v1967_v16 }
 0x567   : > { %3369 = vmatprep.subr.bf16.mxu0 %v3368_v18 }
 0x577   : > { %1157 = vxpose.xlu0.b32.start.end [1/1] (short) (narrow) %v4107_v29, 16 }
 0x57d   : > { %1093 = vxpose.xlu1.b32.start.end [1/1] (short) (narrow) %v4103_v27, 16 }
 0x5c1   : > { %v1928_v19 = vpop.xlane.xlu1 %1927 }
 0x5c2   : > { %3547 = vrcp.f32 %v1928_v19  ;;  %v1925_v20 = vpop.xlane.xlu0 %1924 }
 0x5c3   : > { %3549 = vrcp.f32 %v1925_v20 }
 0x5cb   : > { %v1934_v25 = vpop.xlane.xlu1 %1933 }
 0x5cc   : > { %v3548_v21 = vpop.eup %3547 }
 0x5cd   : > { %v3550_v22 = vpop.eup %3549  ;;  %v1950_v24 = vmul.f32 %v3548_v21, %v3532_v49 }
 0x5ce   : > { %v1948_v23 = vmul.f32 %v3550_v22, %v3534_v51 }
 0x5cf   : > { %v1931_v26 = vpop.xlane.xlu0 %1930 }
 0x5d0   : > { %3551 = vrcp.f32 %v1931_v26  ;;  %3285 = vmatprep.mubr.msk.f32.mxu0 %vm1874_vm3, %v1948_v23 }
 0x5d1   : > { %3286 = vmatmul.mubr.msk.f32.vlgmr.msra.gmra.mrb[2].mxu0 %vm1874_vm3, %v1950_v24 }
 0x5d2   : > { %3371 = vmatpush3.bf16.msra.mxu0 %v3368_v18 }
 0x5d3   : > { %v1940_v30 = vpop.xlane.xlu1 %1939  ;;  %v1937_v29 = vpop.xlane.xlu0 %1936 }
 0x5d4   : > { %3553 = vrcp.f32 %v1940_v30 }
 0x5d5   : > { %3555 = vrcp.f32 %v1937_v29  ;;  %v2602_v29 = vld [vmem:[%s4448_s13 + $0x8] sm:$0xff] }
 0x5d6   : > { %3557 = vrcp.f32 %v1934_v25 }
 0x5d7   : > { %v1943_v36 = vpop.xlane.xlu0 %1942  ;;  %v1946_v38 = vpop.xlane.xlu1 %1945 }
 0x5d8   : > { %3559 = vrcp.f32 %v1943_v36  ;;  %v2608_v36 = vld [vmem:[%s4448_s13 + $0x38] sm:$0xff] }
 0x5d9   : > { %3561 = vrcp.f32 %v1946_v38  ;;  %v2605_v38 = vld [vmem:[%s4448_s13 + $0x20] sm:$0xff] }
 0x5da   : > { %v3552_v27 = vpop.eup %3551 }
 0x5db   : > { %v1952_v31 = vmul.f32 %v3552_v27, %v3538_v3  ;;  %v2458_v3 = vld [vmem:[%s4444_s9 + $0x18] sm:$0xff] }
 0x5dc   : > { %v3380_v4 = vpack.c.bf16 %v2458_v3, %v2457_v2  ;;  %v2604_v27 = vld [vmem:[%s4448_s13 + $0x18] sm:$0xff]  ;;  %v3129_v3 = vld [vmem:[%s4446_s11] ss:$0 sm:$0xff] }
 0x5dd   : > { %3292 = vmatprep.mubr.msk.f32.mxu1 %vm1874_vm3, %v1952_v31  ;;  %v3384_v31 = vpack.c.bf16 %v2604_v27, %v2602_v29  ;;  %v2737_v29 = vld [vmem:[%s4450_s15 + $0x50] sm:$0xff]  ;;  %v2738_v27 = vld [vmem:[%s4450_s15 + $0x58] sm:$0xff] }
 0x5de   : > { %v3554_v32 = vpop.eup %3553 }
 0x5df   : > { %v3556_v33 = vpop.eup %3555  ;;  %v1958_v34 = vmul.f32 %v3554_v32, %v3542_v7  ;;  %v2601_v32 = vld [vmem:[%s4448_s13] sm:$0xff] }
 0x5e0   : > { %v1956_v35 = vmul.f32 %v3556_v33, %v3540_v6  ;;  %v3558_v48 = vpop.eup %3557  ;;  %v2603_v33 = vld [vmem:[%s4448_s13 + $0x10] sm:$0xff] }
 0x5e1   : > { %v1954_v50 = vmul.f32 %v3558_v48, %v4174_v63  ;;  %v3376_v63 = vpack.c.bf16 %v2456_v62, %v2455_v61  ;;  %v2746_v48 = vld [vmem:[%s4450_s15 + $0x98] sm:$0xff] }
 0x5e2   : > { %3299 = vmatprep.mubr.msk.f32.mxu0 %vm1874_vm3, %v1956_v35  ;;  %v3560_v49 = vpop.eup %3559  ;;  %v2606_v35 = vld [vmem:[%s4448_s13 + $0x28] sm:$0xff] }
 0x5e3   : > { %3300 = vmatmul.mubr.msk.f32.vlgmr.msra.gmra.mrb[4].mxu0 %vm1874_vm3, %v1958_v34  ;;  %v3562_v51 = vpop.eup %3561  ;;  %v1960_v28 = vmul.f32 %v3560_v49, %v4181_v10  ;;  %3377 = vmatprep.subr.bf16.mxu0 %v3376_v63  ;;  %v3386_v34 = vpack.c.bf16 %v2603_v33, %v2601_v32  ;;  %v2755_v32 = vld [vmem:[%s4450_s15 + $0xe0] sm:$0xff]  ;;  %v2756_v33 = vld [vmem:[%s4450_s15 + $0xe8] sm:$0xff] }
 0x5e4   : > { %v1962_v52 = vmul.f32 %v3562_v51, %v4183_v11  ;;  %3379 = vmatpush3.bf16.msra.mxu0 %v3376_v63  ;;  %v3126_v11 = vld [vmem:[%s4445_s10] ss:$0 sm:$0xff]  ;;  %v2729_v51 = vld [vmem:[%s4450_s15 + $0x10] sm:$0xff] }
 0x5e5   : > { %3381 = vmatprep.subr.bf16.mxu0 %v3380_v4 }
 0x5e8   : > { %3383 = vmatpush3.bf16.msra.mxu0 %v3380_v4 }
 0x5f7   : > { %v1173_v37 = vpop.trf.xlu0 }
 0x5f8   : > { %1204 = vst.msk [vmem:[#allocation3 + $0x30] sm:$0xff] %vm1189_vm1, %v1173_v37  ;;  %v3388_v37 = vpack.c.bf16 %v2608_v36, %v2606_v35  ;;  %v2739_v35 = vld [vmem:[%s4450_s15 + $0x60] sm:$0xff]  ;;  %v2740_v36 = vld [vmem:[%s4450_s15 + $0x68] sm:$0xff] }
 0x5fb   : > { %v1174_v39 = vpop.trf.xlu0 }
 0x5fc   : > { %1205 = vst.msk [vmem:[#allocation3 + $0x38] sm:$0xff] %vm1189_vm1, %v1174_v39  ;;  %v2607_v39 = vld [vmem:[%s4448_s13 + $0x30] sm:$0xff] }
 0x5fd   : > { %v1109_v40 = vpop.trf.xlu1 }
 0x5fe   : > { %1200 = vst.msk [vmem:[#allocation3 + $0x10] sm:$0xff] %vm1189_vm1, %v1109_v40  ;;  %v3390_v40 = vpack.c.bf16 %v2607_v39, %v2605_v38  ;;  %v2757_v38 = vld [vmem:[%s4450_s15 + $0xf0] sm:$0xff]  ;;  %v2758_v39 = vld [vmem:[%s4450_s15 + $0xf8] sm:$0xff] }
 0x5ff   : > { %v1969_v42 = vld [vmem:[#allocation3 + $0x30] sm:$0xff] }
 0x601   : > { %v1110_v41 = vpop.trf.xlu1 }
 0x602   : > { %1201 = vst.msk [vmem:[#allocation3 + $0x18] sm:$0xff] %vm1189_vm1, %v1110_v41  ;;  %v3783_v41 = vmov 0.0  }
 0x603   : > { %v1970_v43 = vld [vmem:[#allocation3 + $0x38] sm:$0xff]  ;;  %2597 = vst.msk [vmem:[#allocation6] sm:$0xff] %vm765_vm0, %v3783_v41  ;;  %2598 = vst.msk [vmem:[#allocation6 + $0x8] sm:$0xff] %vm765_vm0, %v3783_v41 }
 0x604   : > { %v3372_v47 = vpack.c.bf16 %v1970_v43, %v1969_v42  ;;  %v2743_v42 = vld [vmem:[%s4450_s15 + $0x80] sm:$0xff]  ;;  %v2744_v43 = vld [vmem:[%s4450_s15 + $0x88] sm:$0xff] }
 0x605   : > { %v1965_v44 = vld [vmem:[#allocation3 + $0x10] sm:$0xff] }
 0x609   : > { %v1966_v45 = vld [vmem:[#allocation3 + $0x18] sm:$0xff] }
 0x60a   : > { %v3364_v46 = vpack.c.bf16 %v1966_v45, %v1965_v44  ;;  %v2727_v44 = vld [vmem:[%s4450_s15] sm:$0xff]  ;;  %v3392_v45 = vpack.c.bf16 %v2744_v43, %v2743_v42  ;;  %v2742_v42 = vld [vmem:[%s4450_s15 + $0x78] sm:$0xff] }
 0x60c   : > { %3365 = vmatprep.subr.bf16.mxu1 %v3364_v46  ;;  %3393 = vmatprep.subr.bf16.mxu0 %v3392_v45 }
 0x60d   : > { %3367 = vmatpush3.bf16.msra.mxu1 %v3364_v46  ;;  %v2728_v46 = vld [vmem:[%s4450_s15 + $0x8] sm:$0xff] }
 0x60e   : > { %3373 = vmatprep.subr.bf16.mxu1 %v3372_v47  ;;  %v3394_v49 = vpack.c.bf16 %v2728_v46, %v2727_v44  ;;  %v2611_v44 = vlaneseq }
 0x610   : > { %3293 = vmatmul.mubr.msk.f32.vlgmr.msra.gmra.mrb[10].mxu1 %vm1874_vm3, %v1954_v50  ;;  %v2612_v45 = vshrl.u32 %v2611_v44, 7 }
 0x611   : > { %3375 = vmatpush3.bf16.msra.mxu1 %v3372_v47  ;;  %3306 = vmatprep.mubr.msk.f32.mxu1 %vm1874_vm3, %v1960_v28  ;;  %v2745_v47 = vld [vmem:[%s4450_s15 + $0x90] sm:$0xff]  ;;  %v2730_v28 = vld [vmem:[%s4450_s15 + $0x18] sm:$0xff] }
 0x612   : > { %3385 = vmatprep.subr.bf16.mxu1 %v3384_v31  ;;  %v3396_v50 = vpack.c.bf16 %v2746_v48, %v2745_v47  ;;  %v3414_v31 = vpack.c.bf16 %v2738_v27, %v2737_v29  ;;  %v2613_v46 = vsub.s32 0, %v2612_v45  ;;  %v2609_v47 = vld [vmem:[%s4449_s14] sm:$0x3]  ;;  %v2617_v48 = vsub.s32 1, %v2612_v45 }
 0x614   : > { %3307 = vmatmul.mubr.msk.f32.vlgmr.msra.gmra.mrb[12].mxu1 %vm1874_vm3, %v1962_v52  ;;  %v2747_v52 = vld [vmem:[%s4450_s15 + $0xa0] sm:$0xff] }
 0x615   : > { %3387 = vmatpush1.bf16.msra.mxu1 %v3386_v34  ;;  %2692 = vmatprep.mubr.f32.mxu1 %v3783_v41  ;;  %v3416_v34 = vpack.c.bf16 %v2756_v33, %v2755_v32 }
 0x616   : > { %3389 = vmatprep.subr.bf16.mxu1 %v3388_v37  ;;  %v3418_v37 = vpack.c.bf16 %v2740_v36, %v2739_v35 }
 0x619   : > { %3391 = vmatpush1.bf16.msra.mxu1 %v3390_v40  ;;  %v3420_v40 = vpack.c.bf16 %v2758_v39, %v2757_v38 }
 0x6a4   : > { %v3287_v53 = vpop.f32.mrb[2].mxu0 }
 0x6a5   : > { %v2043_v54 = vpop.f32.mrb[3].mxu0 }
 0x6a6   : > { %2295 = vxpose.xlu1.b32.start [1/2] (short) (narrow) %v2043_v54, 8  ;;  %v3398_v54 = vpack.c.bf16 %v2730_v28, %v2729_v51 }
 0x6aa   : > { %2296 = vxpose.xlu1.b32.end [2/2] (short) (narrow) %v3287_v53, 8  ;;  %v2748_v53 = vld [vmem:[%s4450_s15 + $0xa8] sm:$0xff] }
 0x6b6   : > { %v3301_v55 = vpop.f32.mrb[4].mxu0 }
 0x6b7   : > { %v2205_v56 = vpop.f32.mrb[5].mxu0 }
 0x6b8   : > { %2359 = vxpose.xlu1.b32.start [1/2] (short) (narrow) %v2205_v56, 8  ;;  %v2731_v56 = vld [vmem:[%s4450_s15 + $0x20] sm:$0xff] }
 0x6bc   : > { %2360 = vxpose.xlu1.b32.end [2/2] (short) (narrow) %v3301_v55, 8  ;;  %v3400_v55 = vpack.c.bf16 %v2748_v53, %v2747_v52 }
 0x6e3   : > { %v3294_v57 = vpop.f32.mrb[10].mxu1 }
 0x6e4   : > { %v2124_v58 = vpop.f32.mrb[11].mxu1 }
 0x6e5   : > { %2327 = vxpose.xlu0.b32.start [1/2] (short) (narrow) %v2124_v58, 8 }
 0x6e7   : > { %v3308_v59 = vpop.f32.mrb[12].mxu1 }
 0x6e8   : > { %v2286_v60 = vpop.f32.mrb[13].mxu1 }
 0x6e9   : > { %2328 = vxpose.xlu0.b32.end [2/2] (short) (narrow) %v3294_v57, 8  ;;  %v2732_v57 = vld [vmem:[%s4450_s15 + $0x28] sm:$0xff] }
 0x6ea   : > { %v3402_v58 = vpack.c.bf16 %v2732_v57, %v2731_v56 }
 0x6ed   : > { %2391 = vxpose.xlu0.b32.start [1/2] (short) (narrow) %v2286_v60, 8 }
 0x6f1   : > { %2392 = vxpose.xlu0.b32.end [2/2] (short) (narrow) %v3308_v59, 8 }
 0x726   : > { %v2311_v0 = vpop.trf.xlu1 }
 0x727   : > { %2423 = vxpose.xlu1.b32.start [1/4] (short) (narrow) %v2311_v0, 16 }
 0x738   : > { %v2375_v7 = vpop.trf.xlu1 }
 0x765   : > { %v2343_v6 = vpop.trf.xlu0 }
 0x766   : > { %2424 = vxpose.xlu1.b32.cont [2/4] (short) (narrow) %v2343_v6, 16  ;;  %v3130_v6 = vld [vmem:[%s4447_s12] ss:$0 sm:$0xff] }
 0x76a   : > { %2425 = vxpose.xlu1.b32.cont [3/4] (short) (narrow) %v2375_v7, 16 }
 0x76d   : > { %v2407_v8 = vpop.trf.xlu0 }
 0x76e   : > { %2426 = vxpose.xlu1.b32.end [4/4] (short) (narrow) %v2407_v8, 16 }
 0x7e2   : > { %v2439_v9 = vpop.trf.xlu1 }
 0x7e3   : > { %3317 = vmatprep.mubr.msk.f32.mxu0 %vm765_vm0, %v2439_v9 }
 0x7e6   : > { %v2440_v10 = vpop.trf.xlu1 }
 0x7e7   : > { %3318 = vmatmul.mubr.msk.f32.vlgmr.msra.gmra.mrb[6].mxu0 %vm765_vm0, %v2440_v10 }
 0x7e8   : > { %3395 = vmatpush3.bf16.msra.mxu0 %v3394_v49  ;;  %v2614_v49 = vrot.slane %v2609_v47, %v2613_v46 }
 0x7e9   : > { %3397 = vmatprep.subr.bf16.mxu0 %v3396_v50  ;;  %v2618_v50 = vrot.slane %v2609_v47, %v2617_v48 }
 0x7ec   : > { %3399 = vmatpush3.bf16.msra.mxu0 %v3398_v54 }
 0x7ed   : > { %3401 = vmatprep.subr.bf16.mxu0 %v3400_v55 }
 0x7f0   : > { %3403 = vmatpush3.bf16.msra.mxu0 %v3402_v58 }
 0x8ba   : > { %v3319_v12 = vpop.f32.mrb[6].mxu0 }
 0x8bb   : > { %v2544_v13 = vadd.f32 %v3319_v12, %v3126_v11  ;;  %v2538_v14 = vpop.f32.mrb[7].mxu0 }
 0x8bc   : > { %v2539_v15 = vadd.f32 %v3126_v11, %v2538_v14 }
 0x8bd   : > { %v2548_v16 = vadd.f32 %v2544_v13, %v4064_v5 }
 0x8be   : > { %v2547_v17 = vadd.f32 %v2539_v15, %v4059_v1  ;;  %v2749_v15 = vld [vmem:[%s4450_s15 + $0xb0] sm:$0xff] }
 0x8bf   : > { %2550 = vst.msk [vmem:[#allocation4 + $0x8] sm:$0xff] %vm765_vm0, %v2548_v16  ;;  %v2556_v18 = vsel %vm765_vm0, %v2548_v16, 0.0 }
 0x8c0   : > { %2549 = vst.msk [vmem:[#allocation4] sm:$0xff] %vm765_vm0, %v2547_v17  ;;  %2557 = vadd.xlane.f32.xlu1 %v2556_v18  ;;  %v2553_v19 = vsel %vm765_vm0, %v2547_v17, 0.0  ;;  %v2733_v18 = vld [vmem:[%s4450_s15 + $0x30] sm:$0xff] }
 0x8c1   : > { %2554 = vadd.xlane.f32.xlu0 %v2553_v19  ;;  %v2734_v19 = vld [vmem:[%s4450_s15 + $0x38] sm:$0xff] }
 0x8c6   : > { %v2842_v27 = vld [vmem:[#allocation4 + $0x8] sm:$0xff] }
 0x94d   : > { %v2558_v20 = vpop.xlane.xlu1 %2557 }
 0x94e   : > { %v2560_v21 = vmul.f32 0.03125, %v2558_v20  ;;  %v2555_v22 = vpop.xlane.xlu0 %2554  ;;  %v3406_v20 = vpack.c.bf16 %v2734_v19, %v2733_v18 }
 0x94f   : > { %v2559_v23 = vmul.f32 0.03125, %v2555_v22  ;;  %v2752_v22 = vld [vmem:[%s4450_s15 + $0xc8] sm:$0xff] }
 0x950   : > { %v4231_v24 = vsub.f32 %v2548_v16, %v2560_v21  ;;  %v2750_v16 = vld [vmem:[%s4450_s15 + $0xb8] sm:$0xff]  ;;  %v2751_v21 = vld [vmem:[%s4450_s15 + $0xc0] sm:$0xff] }
 0x951   : > { %v2561_v25 = vsub.f32 %v2547_v17, %v2559_v23  ;;  %v3404_v17 = vpack.c.bf16 %v2750_v16, %v2749_v15  ;;  %v3408_v23 = vpack.c.bf16 %v2752_v22, %v2751_v21  ;;  %v2726_v22 = vld [vmem:[#allocation6 + $0x8] sm:$0xff] }
 0x952   : > { %v2564_v26 = vmul.f32 %v4231_v24, %v4231_v24 }
 0x953   : > { %v2563_v5 = vmul.f32 %v2561_v25, %v2561_v25  ;;  %3405 = vmatprep.subr.bf16.mxu0 %v3404_v17  ;;  %v2725_v17 = vld [vmem:[#allocation6] sm:$0xff] }
 0x954   : > { %v2568_v30 = vsel %vm765_vm0, %v2564_v26, 0.0  ;;  %3407 = vmatpush3.bf16.msra.mxu0 %v3406_v20  ;;  %v2754_v26 = vld [vmem:[%s4450_s15 + $0xd8] sm:$0xff] }
 0x955   : > { %v2565_v1 = vsel %vm765_vm0, %v2563_v5, 0.0  ;;  %3409 = vmatprep.subr.bf16.mxu0 %v3408_v23 }
 0x956   : > { %2566 = vadd.xlane.f32.xlu0 %v2565_v1  ;;  %v2753_v1 = vld [vmem:[%s4450_s15 + $0xd0] sm:$0xff] }
 0x95a   : > { %2569 = vadd.xlane.f32.xlu0 %v2568_v30  ;;  %v3412_v30 = vpack.c.bf16 %v2754_v26, %v2753_v1  ;;  %v3133_v26 = vld [vmem:[%s4496_s28] ss:$0 sm:$0xff] }
 0x9e3   : > { %v2567_v59 = vpop.xlane.xlu0 %2566 }
 0x9e4   : > { %v2571_v60 = vmul.f32 0.03125, %v2567_v59 }
 0x9e6   : > { %v2573_v61 = vadd.f32 1e-05, %v2571_v60 }
 0x9e7   : > { %v2570_v62 = vpop.xlane.xlu0 %2569 }
 0x9e8   : > { %3563 = vrsqrt.f32 %v2573_v61  ;;  %v2572_v63 = vmul.f32 0.03125, %v2570_v62 }
 0x9ea   : > { %v2574_v0 = vadd.f32 1e-05, %v2572_v63 }
 0x9ec   : > { %3565 = vrsqrt.f32 %v2574_v0 }
 0x9f2   : > { %v3564_v2 = vpop.eup %3563 }
 0x9f3   : > { %v2577_v4 = vmul.f32 %v3564_v2, %v2561_v25  ;;  %v2736_v25 = vld [vmem:[%s4450_s15 + $0x48] sm:$0xff] }
 0x9f5   : > { %v2585_v7 = vmul.f32 %v3129_v3, %v2577_v4 }
 0x9f6   : > { %v3566_v8 = vpop.eup %3565 }
 0x9f7   : > { %v2593_v9 = vadd.f32 %v3130_v6, %v2585_v7  ;;  %v2578_v10 = vmul.f32 %v3566_v8, %v4231_v24  ;;  %v2735_v24 = vld [vmem:[%s4450_s15 + $0x40] sm:$0xff] }
 0x9f8   : > { %v3410_v5 = vpack.c.bf16 %v2736_v25, %v2735_v24 }
 0x9f9   : > { %2595 = vst.msk [vmem:[#allocation5] sm:$0xff] %vm765_vm0, %v2593_v9  ;;  %v2586_v11 = vmul.f32 %v3129_v3, %v2578_v10 }
 0x9fa   : > { %3411 = vmatpush3.bf16.msra.mxu0 %v3410_v5  ;;  %v2841_v5 = vld [vmem:[#allocation4] sm:$0xff] }
 0x9fb   : > { %v2594_v12 = vadd.f32 %v3130_v6, %v2586_v11  ;;  %3413 = vmatprep.subr.bf16.mxu0 %v3412_v30 }
 0x9fd   : > { %2596 = vst.msk [vmem:[#allocation5 + $0x8] sm:$0xff] %vm765_vm0, %v2594_v12 }
 0x9fe   : > { %3415 = vmatpush3.bf16.msra.mxu0 %v3414_v31 }
 0x9ff   : > { %3417 = vmatprep.subr.bf16.mxu0 %v3416_v34 }
 0xa00   : > { %v2599_v13 = vld [vmem:[#allocation5] sm:$0xff] }
 0xa01   : > { %3131 = vmatmul.mubr.msk.f32.vlgmr.msra.gmra.mrb[14].mxu1 %vm765_vm0, %v2599_v13 }
 0xa02   : > { %2698 = vmatprep.mubr.f32.mxu1 %v3783_v41  ;;  %3419 = vmatpush3.bf16.msra.mxu0 %v3418_v37  ;;  %v2741_v41 = vld [vmem:[%s4450_s15 + $0x70] sm:$0xff] }
 0xa03   : > { %v3422_v43 = vpack.c.bf16 %v2742_v42, %v2741_v41  ;;  %3421 = vmatprep.subr.bf16.mxu0 %v3420_v40 }
 0xa04   : > { %v2600_v14 = vld [vmem:[#allocation5 + $0x8] sm:$0xff] }
 0xa05   : > { %3132 = vmatmul.mubr.msk.f32.gmra.mrb[16].mxu1 %vm765_vm0, %v2600_v14 }
 0xa06   : > { %3423 = vmatpush3.bf16.msra.mxu0 %v3422_v43 }
 0xad4   : > { %v2694_v51 = vpop.f32.mrb[14].mxu1 }
 0xad5   : > { %v2695_v28 = vadd.f32 %v2694_v51, %v2614_v49  ;;  %v2696_v52 = vpop.f32.mrb[15].mxu1 }
 0xad6   : > { %v2697_v53 = vadd.f32 %v2696_v52, %v2618_v50 }
 0xad7   : > { %v2709_v54 = vmul.f32 0.70710677, %v2695_v28  ;;  %v2705_v4 = vmul.f32 0.5, %v2695_v28 }
 0xad8   : > { %v2710_v55 = vmul.f32 0.70710677, %v2697_v53  ;;  %v2700_v56 = vpop.f32.mrb[16].mxu1  ;;  %v2706_v2 = vmul.f32 0.5, %v2697_v53 }
 0xad9   : > { %3567 = verf.f32 %v2709_v54  ;;  %v2701_v57 = vadd.f32 %v2700_v56, %v2614_v49  ;;  %v2702_v58 = vpop.f32.mrb[17].mxu1 }
 0xada   : > { %3569 = verf.f32 %v2710_v55  ;;  %v2703_v59 = vadd.f32 %v2702_v58, %v2618_v50 }
 0xadb   : > { %v2711_v60 = vmul.f32 0.70710677, %v2701_v57  ;;  %v2707_v13 = vmul.f32 0.5, %v2701_v57 }
 0xadc   : > { %v2712_v61 = vmul.f32 0.70710677, %v2703_v59  ;;  %v2708_v11 = vmul.f32 0.5, %v2703_v59 }
 0xadd   : > { %3571 = verf.f32 %v2711_v60 }
 0xade   : > { %3573 = verf.f32 %v2712_v61 }
 0xae3   : > { %v3568_v62 = vpop.eup %3567 }
 0xae4   : > { %v3570_v63 = vpop.eup %3569  ;;  %v2717_v0 = vadd.f32 1.0, %v3568_v62 }
 0xae5   : > { %v2718_v3 = vadd.f32 1.0, %v3570_v63 }
 0xae6   : > { %v2721_v9 = vmul.f32 %v2717_v0, %v2705_v4 }
 0xae7   : > { %v3572_v6 = vpop.eup %3571  ;;  %v2722_v7 = vmul.f32 %v2718_v3, %v2706_v2 }
 0xae8   : > { %v3574_v8 = vpop.eup %3573  ;;  %v2719_v10 = vadd.f32 1.0, %v3572_v6 }
 0xae9   : > { %v2720_v12 = vadd.f32 1.0, %v3574_v8  ;;  %2823 = vmatprep.mubr.f32.mxu0 %v2722_v7 }
 0xaea   : > { %2824 = vmatmul.mubr.f32.vlgmr.msra.gmra.mrb[8].mxu0 %v2721_v9  ;;  %v2723_v15 = vmul.f32 %v2719_v10, %v2707_v13 }
 0xaeb   : > { %v2724_v14 = vmul.f32 %v2720_v12, %v2708_v11 }
 0xaed   : > { %2828 = vmatprep.mubr.f32.mxu0 %v2724_v14 }
 0xaee   : > { %2829 = vmatmul.mubr.f32.gmra.mrb[10].mxu0 %v2723_v15 }
 0xbbd   : > { %v3225_v16 = vpop.f32.mrb[8].mxu0 }
 0xbbe   : > { %v3226_v18 = vpop.f32.mrb[9].mxu0 }
 0xbbf   : > { %v3227_v19 = vadd.f32 %v3226_v18, %v3225_v16 }
 0xbc1   : > { %v2834_v20 = vadd.f32 %v3227_v19, %v2725_v17  ;;  %v3228_v21 = vpop.f32.mrb[10].mxu0 }
 0xbc2   : > { %v3229_v23 = vpop.f32.mrb[11].mxu0 }
 0xbc3   : > { %2836 = vst.msk [vmem:[#allocation6] sm:$0xff] %vm765_vm0, %v2834_v20  ;;  %v3230_v24 = vadd.f32 %v3229_v23, %v3228_v21 }
 0xbc5   : > { %v2835_v25 = vadd.f32 %v3230_v24, %v2726_v22 }
 0xbc7   : > { %2837 = vst.msk [vmem:[#allocation6 + $0x8] sm:$0xff] %vm765_vm0, %v2835_v25 }
 0xbca   : > { %v2843_v1 = vld [vmem:[#allocation6] sm:$0xff] }
 0xbcb   : > { %v2845_v30 = vadd.f32 %v2843_v1, %v2841_v5 }
 0xbcd   : > { %v2854_v29 = vadd.f32 %v3133_v26, %v2845_v30 }
 0xbce   : > { %v2844_v31 = vld [vmem:[#allocation6 + $0x8] sm:$0xff] }
 0xbcf   : > { %v2846_v32 = vadd.f32 %v2844_v31, %v2842_v27  ;;  %2856 = vst.msk [vmem:[%s711_s21] sm:$0xff] %vm765_vm0, %v2854_v29 }
 0xbd1   : > { %v2855_v33 = vadd.f32 %v3133_v26, %v2846_v32 }
 0xbd3   : > { %2857 = vst.msk [vmem:[%s711_s21 + $0x8] sm:$0xff] %vm765_vm0, %v2855_v33 }
 0xbd4   : > { %3700 = shalt.err (!%p3697_p6)
}
 0xbd5   : > { %s3701_s20 = scalar_lea.hbm %s4384_s0, 256  ;;  %s3705_s1 = scalar_lea.hbm %s4498_s19, 512 }
 0xbd6   : > { %p3702_p7 = scmp.ne.s32.totalorder %s4384_s0, %s3701_s20  ;;  %p3706_p0 = scmp.lt.u32.totalorder %s4384_s0, %s4498_s19 }
 0xbd7   : > { %p3707_p2 = scmp.lt.u32.totalorder %s3705_s1, %s3701_s20  ;;  %p3709_p1 = scmp.lt.u32.totalorder %s3701_s20, %s4384_s0 }
 0xbd8   : > { %p3703_p9 = pnand %p3702_p7, %p4499_p4 }
 0xbd9   : > { %p3708_p13 = por %p3707_p2, %p3706_p0 }
 0xbda   : > { %p3704_p12 = pneg %p3703_p9 }
 0xbdb   : > { %p3710_p8 = por %p3709_p1, %p3708_p13 }
 0xbdd   : > { %p3711_p10 = pnand %p3710_p8, %p3704_p12 }
 0xbdf   : > { %3714 = shalt.err (!%p3711_p10)
}
 0xbe0   : > { %s3785_s21 = smov 128   ;;  %s3786_s23 = smov 8  }
 0xbe1   : > { %3440 = dma.vmem_to_hbm [thread:$0]  (%p4499_p4), %s4386_s4, 256, %s4384_s0, %s4389_s27, %s3785_s21, %s3785_s21, %s3786_s23  }
 0xbe2 PF: > { %s4500_s30 = sld [smem:[#allocation24_spill]]  ;;  %s4501_s25 = sld [smem:[#allocation20_spill]] }
 0xbe3   : > { %s4502_s26 = sld [smem:[#allocation27_spill]] }
 0xbe8   : > { %p3467_p11 = scmp.ge.s32.totalorder %s4500_s30, 2  ;;  %s2889_s22 = sand.u32 1, %s4501_s25  }
 0xbe9   : > { %p4503_p3 = scmp.ne.s32.totalorder %s4502_s26, 0  ;;  %s2890_s29 = scalar_lea.sflag [#allocation9], %s2889_s22 }
 0xbeb   : > { %p3456_p5 = pnand %p3467_p11, %p4503_p3 }
 0xbed   : > { %3752 = dma.done.wait (!%p3456_p5), %s2890_s29, 256  }
 0xbee   : > { %3754 = vsyncadd (!%p3456_p5), %s2890_s29, 4294967040  ;;  %s33_s29 = sadd.s32 1, %s4500_s30   ;;  %s4504_s24 = sld [smem:[#allocation21_spill]] }
 0xbef   : > { %p30_p6 = scmp.ge.s32.totalorder %s33_s29, 4   ;;  %s4505_s25 = sld [smem:[#allocation22_spill]] }
 0xbf0   : > { %s4506_s26 = sld [smem:[#allocation28_spill]]  ;;  %s4507_s27 = sld [smem:[#allocation23_spill]] }
 0xbf1   : > { %s4508_s28 = sld [smem:[#allocation25_spill]]  ;;  %32 = sbr.rel (!%p30_p6) target bundleno = 13 (0xd), region = 167 }
 0xbf8   :  { %2895 = vsyncpa [#allocation8], 1 }
 0xbf9   :  { %2897 = vsyncpa [#allocation8 + $0x1], 1 }
 0xbfa   :  { %2898 = vsyncpa [#allocation11], 1 }
 0xbfb   :  { %2899 = vsyncpa [#allocation14], 1 }
 0xbfc   :  { %2900 = vsyncpa [#allocation9], 1 }
 0xbfd   :  { %2902 = vsyncpa [#allocation9 + $0x1], 1 }

</bundles_post_ra>
